<compile_context>
chip_gen: v6e
topology: v6e:2x2x1
jax: 0.10.0
libtpu: 0.0.40
codegen_flags: <defaults>
</compile_context>

<pallas_src>
import functools

import jax
import jax.numpy as jnp
from jax.experimental import pallas as pl
from jax.experimental.pallas import tpu as pltpu


# ----------------------------------------------------------------------------
# Plain-JAX geometry glue (gathers / topk / sort have no clean Pallas mapping).
# ----------------------------------------------------------------------------
def index_points_jax(points, idx):
    # points: [B, M, C], idx: [B, ...] int -> [B, ..., C]
    return jax.vmap(lambda p, i: p[i])(points, idx)


def knn_point_jax(nsample, xyz, new_xyz):
    # xyz: [B, N, 3] database, new_xyz: [B, S, 3] queries -> idx [B, S, nsample]
    sqr = (-2.0 * jnp.einsum("bsc,bnc->bsn", new_xyz, xyz)
           + jnp.sum(new_xyz ** 2, -1)[:, :, None]
           + jnp.sum(xyz ** 2, -1)[:, None, :])
    _, idx = jax.lax.top_k(-sqr, nsample)   # nearest first
    return idx


def order_index_jax(xyz, new_xyz, new_norm, idx):
    # new_norm: [B, S, 3, 1]
    B, S, C = new_xyz.shape
    grouped_xyz = index_points_jax(xyz, idx)                       # [B,S,K,3]
    g_local = grouped_xyz - new_xyz[:, :, None, :]
    dist_plane = jnp.matmul(g_local, new_norm)                     # [B,S,K,1]
    nrm_row = new_norm.reshape(B, S, 1, C)
    proj_xyz = g_local - dist_plane * nrm_row
    proj_len = jnp.linalg.norm(proj_xyz, axis=-1, keepdims=True)
    proj_unit = proj_xyz / proj_len
    proj_unit = jnp.where(jnp.isnan(proj_unit), 0.0, proj_unit)
    len_max_idx = jnp.argmax(proj_len, axis=2)                     # [B,S,1]
    gather_idx = jnp.broadcast_to(len_max_idx[..., None], (B, S, 1, C))
    vec_ref = jnp.take_along_axis(proj_unit, gather_idx, axis=2)   # [B,S,1,3]
    dots = jnp.matmul(proj_unit, vec_ref.reshape(B, S, C, 1))      # [B,S,K,1]
    sign = jnp.cross(proj_unit, jnp.broadcast_to(vec_ref, proj_unit.shape), axis=-1)
    sign = jnp.matmul(sign, new_norm)                              # [B,S,K,1]
    sign = jnp.sign(sign)
    sign = sign.at[:, :, 0, 0].set(1.0)
    dots = sign * dots - (1.0 - sign)
    d = dots[..., 0]                                               # [B,S,K]
    order = jnp.argsort(-d, axis=2)                                # descending
    dots_sorted = jnp.take_along_axis(d, order, axis=2)[..., None]
    idx_ordered = jnp.take_along_axis(idx, order, axis=2)
    return dots_sorted, idx_ordered


def RI_features_jax(xyz, norm, new_xyz, new_norm, idx):
    B, S, C = new_xyz.shape
    new_norm4 = new_norm[..., None]                                # [B,S,3,1]
    dots_sorted, idx_ordered = order_index_jax(xyz, new_xyz, new_norm4, idx)
    eps = 1e-7
    grouped_xyz = index_points_jax(xyz, idx_ordered)               # [B,S,K,3]
    g_local = grouped_xyz - new_xyz[:, :, None, :]
    g_len = jnp.linalg.norm(g_local, axis=-1, keepdims=True)
    g_unit = g_local / g_len
    g_unit = jnp.where(jnp.isnan(g_unit), 0.0, g_unit)
    g_norm = index_points_jax(norm, idx_ordered)
    angle_0 = jnp.matmul(g_unit, new_norm4)
    angle_1 = jnp.sum(g_unit * g_norm, -1, keepdims=True)
    angle_norm = jnp.matmul(g_norm, new_norm4)
    angle_norm = jnp.arccos(jnp.clip(angle_norm, -1.0 + eps, 1.0 - eps))
    # NOTE: literal PyTorch semantics — D_0 is a bool tensor and `D_0[D_0==0]=-1`
    # casts -1 to True, so the multiplier is 1.0 everywhere. Replicated as-is.
    inner_vec = g_local - jnp.roll(g_local, 1, axis=2)
    inner_len = jnp.linalg.norm(inner_vec, axis=-1, keepdims=True)
    inner_unit = inner_vec / inner_len
    inner_unit = jnp.where(jnp.isnan(inner_unit), 0.0, inner_unit)
    inner_angle_0 = jnp.sum(inner_unit * g_norm, -1, keepdims=True)
    inner_angle_1 = jnp.sum(inner_unit * jnp.roll(g_norm, 1, axis=2), -1, keepdims=True)
    inner_angle_2 = jnp.sum(g_norm * jnp.roll(g_norm, 1, axis=2), -1, keepdims=True)
    inner_angle_2 = jnp.arccos(jnp.clip(inner_angle_2, -1.0 + eps, 1.0 - eps))
    # same bool-cast quirk for D_1 -> multiplier 1.0
    proj_feat = dots_sorted - jnp.roll(dots_sorted, 1, axis=2)
    proj_feat = proj_feat.at[:, :, 0, 0].set(-3.0 - dots_sorted[:, :, -1, 0])
    ri_feat = jnp.concatenate(
        [g_len, proj_feat, angle_0, angle_1, angle_norm,
         inner_angle_0, inner_angle_1, inner_angle_2], axis=-1)    # [B,S,K,8]
    return ri_feat, idx_ordered


def _round_up(x, m):
    return ((x + m - 1) // m) * m


def _pick_group(K, pref):
    # largest power-of-2 divisor of K that is <= pref
    g = 1
    while g * 2 <= pref and K % (g * 2) == 0:
        g *= 2
    return g


def _device_defaults():
    kind = ""
    try:
        kind = jax.devices()[0].device_kind.lower()
    except Exception:
        pass
    # 128-wide-MXU generations (<= v5) -> 2 neighbors/chunk; v6e/v7x (256) -> 4.
    narrow_mxu = any(t in kind for t in ("v2", "v3", "v4", "v5"))
    group = 2 if narrow_mxu else 4
    # 128 MiB VMEM chips (v5e/v6e) run 1024-row tiles; v7x (64 MiB) / unknown: 512.
    big_vmem = narrow_mxu or ("v6" in kind)
    tile = 1024 if big_vmem else 512
    vmem_limit = (64 << 20) if big_vmem else None
    return group, tile, vmem_limit


# ----------------------------------------------------------------------------
# Fused Pallas kernel: prev_mlp -> concat(grouped feats) -> mlp -> max over K
# -> concat(points1) -> mlp2.
# Lanes of the merged input are ordered [ri (k,c) | gp (k,c) | points1], each
# group zero-padded to a 128-lane multiple; the per-neighbor 1x1 convs run as
# G-neighbor diagonal chunks sized to the MXU (the same small kron(I_G, W)
# weight is reused for every chunk), so the kernel needs no lane<->sublane
# reshapes and no off-boundary lane extracts.
# ----------------------------------------------------------------------------
def fused_mlp_kernel(xin_ref,
                     w0a_ref, w0b_ref, w1ah_ref, w1ag_ref, w1b_ref,
                     w2ax_ref, w2ap_ref, w2b_ref, bias_ref,
                     out_ref, *,
                     nsample, group, wri, wgp, wp1,
                     c0a, cmid, m0, m1, m2a, m2, use_roll):
    K, G = nsample, group
    NC = K // G
    f32 = jnp.float32
    cdt = xin_ref.dtype           # compute dtype (bf16 or f32)

    ri = xin_ref[:, :wri]                         # (T, Wri)   lanes = (k, c)+pad
    gp = xin_ref[:, wri:wri + wgp]                # (T, Wgp)   lanes = (k, c)+pad
    p1 = xin_ref[:, wri + wgp:wri + wgp + wp1]    # (T, Wp1)   points1 + pad

    b0a = bias_ref[0:1, :K * c0a]
    b0b = bias_ref[1:2, :G * cmid]
    b1a = bias_ref[2:3, :K * m0]
    b1b = bias_ref[3:4, :G * m1]
    b2a = bias_ref[4:5, :m2a]
    b2b = bias_ref[5:6, :m2]

    def dot(a, wref):
        # bf16 x bf16 -> f32 accumulation on the MXU (f32 x f32 if cdt == f32).
        return jnp.dot(a, wref[...], preferred_element_type=f32)

    # prev_mlp[0]: single small full block-diagonal matmul (one MXU tile pass).
    h0 = jnp.maximum(dot(ri, w0a_ref) + b0a, 0.0)                  # (T, K*c0a)

    # grouped-points half of mlp_convs[0]: full width (same pass count as
    # chunking, keeps the 128-lane gp stream unsliced).
    xg = dot(gp, w1ag_ref) + b1a                                   # (T, K*m0)

    # per-neighbor layers in G-neighbor diagonal chunks sized to the MXU;
    # the K-max starts as a running max over chunk outputs.
    maxed = None
    for j in range(NC):
        hj = h0[:, j * G * c0a:(j + 1) * G * c0a].astype(cdt)
        hj = jnp.maximum(dot(hj, w0b_ref) + b0b, 0.0)              # (T, G*cmid)
        xj = dot(hj.astype(cdt), w1ah_ref) + xg[:, j * G * m0:(j + 1) * G * m0]
        xj = jnp.maximum(xj, 0.0)
        yj = jnp.maximum(dot(xj.astype(cdt), w1b_ref) + b1b, 0.0)  # (T, G*m1)
        maxed = yj if maxed is None else jnp.maximum(maxed, yj)

    # within-chunk neighbor max: lane-halving at block boundaries; the final
    # 64-vs-64 pair goes through one XLU roll (no masked 64-lane extracts).
    width = G * m1
    while width > m1:
        if use_roll and width == 128:
            maxed = jnp.maximum(maxed, pltpu.roll(maxed, 64, axis=1))
            break                                   # 128 lanes, max duplicated
        half = width // 2
        maxed = jnp.maximum(maxed[:, :half], maxed[:, half:])
        width = half

    # mlp_convs_2 on cat([maxed features, points1]) as split matmuls; zero rows
    # in w2ax/w2ap absorb the duplicated / padded lanes.
    y = dot(maxed.astype(cdt), w2ax_ref) + dot(p1, w2ap_ref) + b2a
    y = jnp.maximum(y, 0.0)
    out_ref[...] = jnp.maximum(dot(y.astype(cdt), w2b_ref) + b2b, 0.0)


def fused_mlp_pallas(ri, gp, p1, folded, *, tile=None, group=None,
                     compute_dtype=jnp.bfloat16, vmem_limit_bytes=None):
    """ri: [BN, K, 8], gp: [BN, K, C2], p1: [BN, C1] -> [BN, mlp2[-1]] (f32)."""
    BN, K, Cri = ri.shape
    C2 = gp.shape[-1]
    C1 = p1.shape[-1]
    (w0a, b0a), (w0b, b0b), (w1a, b1a), (w1b, b1b), (w2a, b2a), (w2b, b2b) = folded
    c0a = w0a.shape[1]            # 32
    cmid = w0b.shape[1]           # 64  (prev_mlp output channels)
    m0 = w1b.shape[0]             # mlp[0]
    M1 = w1b.shape[1]             # mlp[1]
    m2a = w2b.shape[0]            # mlp2[0]
    M2 = w2b.shape[1]             # mlp2[1]
    cdt = compute_dtype

    dev_group, dev_tile, dev_vmem = _device_defaults()
    if group is None:
        group = dev_group
    if tile is None:
        tile = dev_tile
    if vmem_limit_bytes is None:
        vmem_limit_bytes = dev_vmem
    G = _pick_group(K, group)
    use_roll = (M1 == 64 and G >= 2)

    # --- lane-padded (128-multiple) input groups, merged into one stream ---
    Wri = _round_up(K * Cri, 128)
    Wgp = _round_up(K * C2, 128)
    Wp1 = _round_up(C1, 128)
    Wtot = Wri + Wgp + Wp1

    # --- row tile: large, aligned, and >= 2 grid steps when BN allows (v7x) ---
    ALIGN = 32
    tile = max(ALIGN, (tile // ALIGN) * ALIGN)
    tile = min(tile, _round_up(pl.cdiv(BN, 2), ALIGN))
    BN_pad = _round_up(BN, tile)
    grid = (BN_pad // tile,)

    ri_f = jnp.pad(ri.reshape(BN, K * Cri), ((0, 0), (0, Wri - K * Cri)))
    gp_f = jnp.pad(gp.reshape(BN, K * C2), ((0, 0), (0, Wgp - K * C2)))
    p1_f = jnp.pad(p1, ((0, 0), (0, Wp1 - C1)))
    xin = jnp.concatenate([ri_f, gp_f, p1_f], axis=-1).astype(cdt)
    if BN_pad > BN:
        xin = jnp.pad(xin, ((0, BN_pad - BN), (0, 0)))

    # --- weights: small full block-diagonals + shared G-neighbor diagonal chunks ---
    eyeK = jnp.eye(K, dtype=jnp.float32)
    eyeG = jnp.eye(G, dtype=jnp.float32)
    w1a_h, w1a_g = w1a[:cmid, :], w1a[cmid:, :]
    w2a_x, w2a_p = w2a[:M1, :], w2a[M1:, :]

    w0a_f = jnp.pad(jnp.kron(eyeK, w0a), ((0, Wri - K * Cri), (0, 0))).astype(cdt)
    w1ag_f = jnp.pad(jnp.kron(eyeK, w1a_g), ((0, Wgp - K * C2), (0, 0))).astype(cdt)
    w0b_g = jnp.kron(eyeG, w0b).astype(cdt)         # (G*32,  G*cmid)
    w1ah_g = jnp.kron(eyeG, w1a_h).astype(cdt)      # (G*cmid, G*m0)
    w1b_g = jnp.kron(eyeG, w1b).astype(cdt)         # (G*m0,  G*M1)
    if use_roll:   # zero rows absorb the duplicated 128-wide rolled max
        w2ax = jnp.pad(w2a_x, ((0, 128 - M1), (0, 0))).astype(cdt)
    else:
        w2ax = w2a_x.astype(cdt)
    w2ap = jnp.pad(w2a_p, ((0, Wp1 - C1), (0, 0))).astype(cdt)
    w2bc = w2b.astype(cdt)

    # --- biases packed into one lane-aligned f32 buffer (f32 add path) ---
    btiled = [jnp.tile(b0a.reshape(-1), K), jnp.tile(b0b.reshape(-1), G),
              jnp.tile(b1a.reshape(-1), K), jnp.tile(b1b.reshape(-1), G),
              b2a.reshape(-1), b2b.reshape(-1)]
    bwidth = _round_up(max(int(b.shape[0]) for b in btiled), 128)
    bias_pack = jnp.stack(
        [jnp.pad(b, (0, bwidth - b.shape[0])) for b in btiled]
        + [jnp.zeros((bwidth,), jnp.float32)] * 2).astype(jnp.float32)  # (8,bw)

    weights = [w0a_f, w0b_g, w1ah_g, w1ag_f, w1b_g, w2ax, w2ap, w2bc, bias_pack]

    kernel = functools.partial(
        fused_mlp_kernel, nsample=K, group=G, wri=Wri, wgp=Wgp, wp1=Wp1,
        c0a=c0a, cmid=cmid, m0=m0, m1=M1, m2a=m2a, m2=M2, use_roll=use_roll)

    cp_kwargs = dict(dimension_semantics=("parallel",))
    if vmem_limit_bytes is not None:
        cp_kwargs["vmem_limit_bytes"] = int(vmem_limit_bytes)

    out = pl.pallas_call(
        kernel,
        out_shape=jax.ShapeDtypeStruct((BN_pad, M2), jnp.float32),
        grid=grid,
        in_specs=[pl.BlockSpec((tile, Wtot), lambda i: (i, 0))]
                 + [pl.BlockSpec(w.shape, lambda i, nd=w.ndim: (0,) * nd)
                    for w in weights],
        out_specs=pl.BlockSpec((tile, M2), lambda i: (i, 0)),
        compiler_params=pltpu.CompilerParams(**cp_kwargs),
    )(xin, *weights)
    return out[:BN]


# ----------------------------------------------------------------------------
# Parameter construction (deterministic), with BatchNorm (eval) folded in.
# ----------------------------------------------------------------------------
def make_layer(key, cin, cout):
    k1, k2, k3, k4 = jax.random.split(key, 4)
    w = 0.1 * jax.random.normal(k1, (cin, cout), jnp.float32)   # conv 1x1 as (in,out)
    b = 0.1 * jax.random.normal(k2, (cout,), jnp.float32)
    gamma = 1.0 + 0.1 * jax.random.normal(k3, (cout,), jnp.float32)
    beta = 0.1 * jax.random.normal(k4, (cout,), jnp.float32)
    mean = jnp.zeros((cout,), jnp.float32)
    var = jnp.ones((cout,), jnp.float32)
    scale = gamma / jnp.sqrt(var + 1e-5)
    w_eff = w * scale[None, :]
    b_eff = (b - mean) * scale + beta
    return w_eff, b_eff.reshape(1, cout)


def init_params(key, c2, c1, mlp, mlp2):
    ks = jax.random.split(key, 6)
    return (
        make_layer(ks[0], 8, 32),                 # prev_mlp[0]
        make_layer(ks[1], 32, 64),                # prev_mlp[1]
        make_layer(ks[2], 64 + c2, mlp[0]),       # mlp_convs[0]
        make_layer(ks[3], mlp[0], mlp[1]),        # mlp_convs[1]
        make_layer(ks[4], mlp[1] + c1, mlp2[0]),  # mlp_convs_2[0]
        make_layer(ks[5], mlp2[0], mlp2[1]),      # mlp_convs_2[1]
    )


# ----------------------------------------------------------------------------
# Full forward (mirrors RIConv2FeaturePropagation_v2.forward)
# ----------------------------------------------------------------------------
def riconv2_fp_v2_forward(params, xyz1, xyz2, norm1, norm2, points1, points2,
                          nsample, *, tile=None, group=None,
                          compute_dtype=jnp.bfloat16):
    B, N, _ = xyz1.shape
    points2_t = jnp.transpose(points2, (0, 2, 1))                  # [B,S,C2]
    idx = knn_point_jax(nsample, xyz2, xyz1)                       # [B,N,K]
    ri_feat, idx_ordered = RI_features_jax(xyz2, norm2, xyz1, norm1, idx)
    grouped_points = index_points_jax(points2_t, idx_ordered)      # [B,N,K,C2]

    K = nsample
    ri_flat = ri_feat.reshape(B * N, K, ri_feat.shape[-1])
    gp_flat = grouped_points.reshape(B * N, K, grouped_points.shape[-1])
    p1_flat = jnp.transpose(points1, (0, 2, 1)).reshape(B * N, -1)  # [BN,C1]

    out_flat = fused_mlp_pallas(ri_flat, gp_flat, p1_flat, params,
                                tile=tile, group=group,
                                compute_dtype=compute_dtype)
    M2 = out_flat.shape[-1]
    return jnp.transpose(out_flat.reshape(B, N, M2), (0, 2, 1))     # [B,M2,N]


def _mlp_reference(ri, gp, p1, folded, compute_dtype=jnp.bfloat16):
    # pure-jnp reference of the fused kernel (same bf16 quantization points)
    (w0a, b0a), (w0b, b0b), (w1a, b1a), (w1b, b1b), (w2a, b2a), (w2b, b2b) = folded
    cdt = compute_dtype
    f32 = jnp.float32
    BN, K, Cri = ri.shape
    Cmid = w0b.shape[1]
    M1 = w1b.shape[1]
    r = ri.reshape(BN * K, Cri).astype(cdt)
    g = gp.reshape(BN * K, -1).astype(cdt)
    dot = lambda a, w: jnp.dot(a, w.astype(cdt), preferred_element_type=f32)
    h = jnp.maximum(dot(r, w0a) + b0a, 0.0)
    h = jnp.maximum(dot(h.astype(cdt), w0b) + b0b, 0.0)
    x = dot(h.astype(cdt), w1a[:Cmid]) + dot(g, w1a[Cmid:]) + b1a
    x = jnp.maximum(x, 0.0)
    x = jnp.maximum(dot(x.astype(cdt), w1b) + b1b, 0.0)
    m = jnp.max(x.reshape(BN, K, -1), axis=1)
    y = dot(m.astype(cdt), w2a[:M1]) + dot(p1.astype(cdt), w2a[M1:]) + b2a
    y = jnp.maximum(y, 0.0)
    y = jnp.maximum(dot(y.astype(cdt), w2b) + b2b, 0.0)
    return y


if __name__ == "__main__":
    key = jax.random.PRNGKey(0)
    B, N, S, K = 2, 16, 16, 8
    C1, C2 = 16, 16                 # points1 / points2 channels
    mlp, mlp2 = [64, 64], [64, 32]  # in_channel = 64+C2, in_channel_2 = mlp[-1]+C1

    ks = jax.random.split(key, 8)
    unit = lambda v: v / jnp.linalg.norm(v, axis=-1, keepdims=True)
    xyz1 = jax.random.normal(ks[0], (B, N, 3), jnp.float32)
    xyz2 = jax.random.normal(ks[1], (B, S, 3), jnp.float32)
    norm1 = unit(jax.random.normal(ks[2], (B, N, 3), jnp.float32))
    norm2 = unit(jax.random.normal(ks[3], (B, S, 3), jnp.float32))
    points1 = jax.random.normal(ks[4], (B, C1, N), jnp.float32)
    points2 = jax.random.normal(ks[5], (B, C2, S), jnp.float32)

    params = init_params(ks[6], C2, C1, mlp, mlp2)

    out = riconv2_fp_v2_forward(params, xyz1, xyz2, norm1, norm2,
                                points1, points2, K)
    out = jax.block_until_ready(out)
    assert out.shape == (B, mlp2[-1], N), out.shape

    # self-check of the fused Pallas MLP path against a pure-jnp reference
    idx = knn_point_jax(K, xyz2, xyz1)
    ri_feat, idx_ordered = RI_features_jax(xyz2, norm2, xyz1, norm1, idx)
    gp = index_points_jax(jnp.transpose(points2, (0, 2, 1)), idx_ordered)
    ref = _mlp_reference(ri_feat.reshape(B * N, K, 8),
                         gp.reshape(B * N, K, C2),
                         jnp.transpose(points1, (0, 2, 1)).reshape(B * N, C1),
                         params)
    ref = jnp.transpose(ref.reshape(B, N, -1), (0, 2, 1))
    assert jnp.allclose(out, ref, atol=2e-2, rtol=2e-2), \
        float(jnp.max(jnp.abs(out - ref)))

    print("KERNEL_OK")
</pallas_src>

<mosaic_0001>
module attributes {stable_mosaic.version = 11 : i64} {
  func.func @fused_mlp_kernel(%arg0: i32, %arg1: memref<32x384xbf16, #tpu.memory_space<vmem>>, %arg2: memref<128x256xbf16, #tpu.memory_space<vmem>>, %arg3: memref<128x256xbf16, #tpu.memory_space<vmem>>, %arg4: memref<256x256xbf16, #tpu.memory_space<vmem>>, %arg5: memref<128x512xbf16, #tpu.memory_space<vmem>>, %arg6: memref<256x256xbf16, #tpu.memory_space<vmem>>, %arg7: memref<128x64xbf16, #tpu.memory_space<vmem>>, %arg8: memref<128x64xbf16, #tpu.memory_space<vmem>>, %arg9: memref<64x32xbf16, #tpu.memory_space<vmem>>, %arg10: memref<8x512xf32, #tpu.memory_space<vmem>>, %arg11: memref<32x32xf32, #tpu.memory_space<vmem>>) attributes {dimension_semantics = [#tpu.dimension_semantics<parallel>], iteration_bounds = array<i64: 1>, scalar_prefetch = 0 : i64, scratch_operands = 0 : i64, tpu.core_type = #tpu.core_type<tc>, window_params = [{transform_indices = @transform_0, window_bounds = array<i64: 32, 384>}, {pipeline_mode = #tpu.pipeline_mode<synchronous>, transform_indices = @transform_1, window_bounds = array<i64: 128, 256>}, {pipeline_mode = #tpu.pipeline_mode<synchronous>, transform_indices = @transform_2, window_bounds = array<i64: 128, 256>}, {pipeline_mode = #tpu.pipeline_mode<synchronous>, transform_indices = @transform_3, window_bounds = array<i64: 256, 256>}, {pipeline_mode = #tpu.pipeline_mode<synchronous>, transform_indices = @transform_4, window_bounds = array<i64: 128, 512>}, {pipeline_mode = #tpu.pipeline_mode<synchronous>, transform_indices = @transform_5, window_bounds = array<i64: 256, 256>}, {pipeline_mode = #tpu.pipeline_mode<synchronous>, transform_indices = @transform_6, window_bounds = array<i64: 128, 64>}, {pipeline_mode = #tpu.pipeline_mode<synchronous>, transform_indices = @transform_7, window_bounds = array<i64: 128, 64>}, {pipeline_mode = #tpu.pipeline_mode<synchronous>, transform_indices = @transform_8, window_bounds = array<i64: 64, 32>}, {pipeline_mode = #tpu.pipeline_mode<synchronous>, transform_indices = @transform_9, window_bounds = array<i64: 8, 512>}, {transform_indices = @transform_10, window_bounds = array<i64: 32, 32>}]} {
    %c0 = arith.constant 0 : index
    %c0_0 = arith.constant 0 : index
    %0 = vector.load %arg1[%c0, %c0_0] : memref<32x384xbf16, #tpu.memory_space<vmem>>, vector<32x128xbf16>
    %c0_1 = arith.constant 0 : index
    %c128 = arith.constant 128 : index
    %1 = vector.load %arg1[%c0_1, %c128] : memref<32x384xbf16, #tpu.memory_space<vmem>>, vector<32x128xbf16>
    %c0_2 = arith.constant 0 : index
    %c256 = arith.constant 256 : index
    %2 = vector.load %arg1[%c0_2, %c256] : memref<32x384xbf16, #tpu.memory_space<vmem>>, vector<32x128xbf16>
    %c0_3 = arith.constant 0 : index
    %c0_4 = arith.constant 0 : index
    %3 = vector.load %arg10[%c0_3, %c0_4] : memref<8x512xf32, #tpu.memory_space<vmem>>, vector<1x256xf32>
    %c1 = arith.constant 1 : index
    %c0_5 = arith.constant 0 : index
    %4 = vector.load %arg10[%c1, %c0_5] : memref<8x512xf32, #tpu.memory_space<vmem>>, vector<1x256xf32>
    %c2 = arith.constant 2 : index
    %c0_6 = arith.constant 0 : index
    %5 = vector.load %arg10[%c2, %c0_6] : memref<8x512xf32, #tpu.memory_space<vmem>>, vector<1x512xf32>
    %c3 = arith.constant 3 : index
    %c0_7 = arith.constant 0 : index
    %6 = vector.load %arg10[%c3, %c0_7] : memref<8x512xf32, #tpu.memory_space<vmem>>, vector<1x256xf32>
    %c4 = arith.constant 4 : index
    %c0_8 = arith.constant 0 : index
    %7 = vector.load %arg10[%c4, %c0_8] : memref<8x512xf32, #tpu.memory_space<vmem>>, vector<1x64xf32>
    %c5 = arith.constant 5 : index
    %c0_9 = arith.constant 0 : index
    %8 = vector.load %arg10[%c5, %c0_9] : memref<8x512xf32, #tpu.memory_space<vmem>>, vector<1x32xf32>
    %c0_10 = arith.constant 0 : index
    %c0_11 = arith.constant 0 : index
    %9 = vector.load %arg2[%c0_10, %c0_11] : memref<128x256xbf16, #tpu.memory_space<vmem>>, vector<128x256xbf16>
    %cst = arith.constant dense<0.000000e+00> : vector<32x256xf32>
    %10 = tpu.matmul %0, %9, %cst {dimension_numbers = #tpu.dot_dimension_numbers<[1], [0], [0], [1], [0, 0, 1, 1], [], []>} : vector<32x128xbf16>, vector<128x256xbf16>, vector<32x256xf32> -> vector<32x256xf32>
    %11 = vector.broadcast %3 : vector<1x256xf32> to vector<32x256xf32>
    %12 = arith.addf %10, %11 : vector<32x256xf32>
    %cst_12 = arith.constant 0.000000e+00 : f32
    %13 = vector.broadcast %cst_12 : f32 to vector<32x256xf32>
    %14 = arith.maximumf %12, %13 : vector<32x256xf32>
    %c0_13 = arith.constant 0 : index
    %c0_14 = arith.constant 0 : index
    %15 = vector.load %arg5[%c0_13, %c0_14] : memref<128x512xbf16, #tpu.memory_space<vmem>>, vector<128x512xbf16>
    %cst_15 = arith.constant dense<0.000000e+00> : vector<32x512xf32>
    %16 = tpu.matmul %1, %15, %cst_15 {dimension_numbers = #tpu.dot_dimension_numbers<[1], [0], [0], [1], [0, 0, 1, 1], [], []>} : vector<32x128xbf16>, vector<128x512xbf16>, vector<32x512xf32> -> vector<32x512xf32>
    %17 = vector.broadcast %5 : vector<1x512xf32> to vector<32x512xf32>
    %18 = arith.addf %16, %17 : vector<32x512xf32>
    %19 = vector.extract_strided_slice %14 {offsets = [0, 0], sizes = [32, 128], strides = [1, 1]} : vector<32x256xf32> to vector<32x128xf32>
    %20 = arith.truncf %19 : vector<32x128xf32> to vector<32x128xbf16>
    %c0_16 = arith.constant 0 : index
    %c0_17 = arith.constant 0 : index
    %21 = vector.load %arg3[%c0_16, %c0_17] : memref<128x256xbf16, #tpu.memory_space<vmem>>, vector<128x256xbf16>
    %cst_18 = arith.constant dense<0.000000e+00> : vector<32x256xf32>
    %22 = tpu.matmul %20, %21, %cst_18 {dimension_numbers = #tpu.dot_dimension_numbers<[1], [0], [0], [1], [0, 0, 1, 1], [], []>} : vector<32x128xbf16>, vector<128x256xbf16>, vector<32x256xf32> -> vector<32x256xf32>
    %23 = vector.broadcast %4 : vector<1x256xf32> to vector<32x256xf32>
    %24 = arith.addf %22, %23 : vector<32x256xf32>
    %cst_19 = arith.constant 0.000000e+00 : f32
    %25 = vector.broadcast %cst_19 : f32 to vector<32x256xf32>
    %26 = arith.maximumf %24, %25 : vector<32x256xf32>
    %27 = arith.truncf %26 : vector<32x256xf32> to vector<32x256xbf16>
    %c0_20 = arith.constant 0 : index
    %c0_21 = arith.constant 0 : index
    %28 = vector.load %arg4[%c0_20, %c0_21] : memref<256x256xbf16, #tpu.memory_space<vmem>>, vector<256x256xbf16>
    %cst_22 = arith.constant dense<0.000000e+00> : vector<32x256xf32>
    %29 = tpu.matmul %27, %28, %cst_22 {dimension_numbers = #tpu.dot_dimension_numbers<[1], [0], [0], [1], [0, 0, 1, 1], [], []>} : vector<32x256xbf16>, vector<256x256xbf16>, vector<32x256xf32> -> vector<32x256xf32>
    %30 = vector.extract_strided_slice %18 {offsets = [0, 0], sizes = [32, 256], strides = [1, 1]} : vector<32x512xf32> to vector<32x256xf32>
    %31 = arith.addf %29, %30 : vector<32x256xf32>
    %cst_23 = arith.constant 0.000000e+00 : f32
    %32 = vector.broadcast %cst_23 : f32 to vector<32x256xf32>
    %33 = arith.maximumf %31, %32 : vector<32x256xf32>
    %34 = arith.truncf %33 : vector<32x256xf32> to vector<32x256xbf16>
    %c0_24 = arith.constant 0 : index
    %c0_25 = arith.constant 0 : index
    %35 = vector.load %arg6[%c0_24, %c0_25] : memref<256x256xbf16, #tpu.memory_space<vmem>>, vector<256x256xbf16>
    %cst_26 = arith.constant dense<0.000000e+00> : vector<32x256xf32>
    %36 = tpu.matmul %34, %35, %cst_26 {dimension_numbers = #tpu.dot_dimension_numbers<[1], [0], [0], [1], [0, 0, 1, 1], [], []>} : vector<32x256xbf16>, vector<256x256xbf16>, vector<32x256xf32> -> vector<32x256xf32>
    %37 = vector.broadcast %6 : vector<1x256xf32> to vector<32x256xf32>
    %38 = arith.addf %36, %37 : vector<32x256xf32>
    %cst_27 = arith.constant 0.000000e+00 : f32
    %39 = vector.broadcast %cst_27 : f32 to vector<32x256xf32>
    %40 = arith.maximumf %38, %39 : vector<32x256xf32>
    %41 = vector.extract_strided_slice %14 {offsets = [0, 128], sizes = [32, 128], strides = [1, 1]} : vector<32x256xf32> to vector<32x128xf32>
    %42 = arith.truncf %41 : vector<32x128xf32> to vector<32x128xbf16>
    %c0_28 = arith.constant 0 : index
    %c0_29 = arith.constant 0 : index
    %43 = vector.load %arg3[%c0_28, %c0_29] : memref<128x256xbf16, #tpu.memory_space<vmem>>, vector<128x256xbf16>
    %cst_30 = arith.constant dense<0.000000e+00> : vector<32x256xf32>
    %44 = tpu.matmul %42, %43, %cst_30 {dimension_numbers = #tpu.dot_dimension_numbers<[1], [0], [0], [1], [0, 0, 1, 1], [], []>} : vector<32x128xbf16>, vector<128x256xbf16>, vector<32x256xf32> -> vector<32x256xf32>
    %45 = vector.broadcast %4 : vector<1x256xf32> to vector<32x256xf32>
    %46 = arith.addf %44, %45 : vector<32x256xf32>
    %cst_31 = arith.constant 0.000000e+00 : f32
    %47 = vector.broadcast %cst_31 : f32 to vector<32x256xf32>
    %48 = arith.maximumf %46, %47 : vector<32x256xf32>
    %49 = arith.truncf %48 : vector<32x256xf32> to vector<32x256xbf16>
    %c0_32 = arith.constant 0 : index
    %c0_33 = arith.constant 0 : index
    %50 = vector.load %arg4[%c0_32, %c0_33] : memref<256x256xbf16, #tpu.memory_space<vmem>>, vector<256x256xbf16>
    %cst_34 = arith.constant dense<0.000000e+00> : vector<32x256xf32>
    %51 = tpu.matmul %49, %50, %cst_34 {dimension_numbers = #tpu.dot_dimension_numbers<[1], [0], [0], [1], [0, 0, 1, 1], [], []>} : vector<32x256xbf16>, vector<256x256xbf16>, vector<32x256xf32> -> vector<32x256xf32>
    %52 = vector.extract_strided_slice %18 {offsets = [0, 256], sizes = [32, 256], strides = [1, 1]} : vector<32x512xf32> to vector<32x256xf32>
    %53 = arith.addf %51, %52 : vector<32x256xf32>
    %cst_35 = arith.constant 0.000000e+00 : f32
    %54 = vector.broadcast %cst_35 : f32 to vector<32x256xf32>
    %55 = arith.maximumf %53, %54 : vector<32x256xf32>
    %56 = arith.truncf %55 : vector<32x256xf32> to vector<32x256xbf16>
    %c0_36 = arith.constant 0 : index
    %c0_37 = arith.constant 0 : index
    %57 = vector.load %arg6[%c0_36, %c0_37] : memref<256x256xbf16, #tpu.memory_space<vmem>>, vector<256x256xbf16>
    %cst_38 = arith.constant dense<0.000000e+00> : vector<32x256xf32>
    %58 = tpu.matmul %56, %57, %cst_38 {dimension_numbers = #tpu.dot_dimension_numbers<[1], [0], [0], [1], [0, 0, 1, 1], [], []>} : vector<32x256xbf16>, vector<256x256xbf16>, vector<32x256xf32> -> vector<32x256xf32>
    %59 = vector.broadcast %6 : vector<1x256xf32> to vector<32x256xf32>
    %60 = arith.addf %58, %59 : vector<32x256xf32>
    %cst_39 = arith.constant 0.000000e+00 : f32
    %61 = vector.broadcast %cst_39 : f32 to vector<32x256xf32>
    %62 = arith.maximumf %60, %61 : vector<32x256xf32>
    %63 = arith.maximumf %40, %62 : vector<32x256xf32>
    %64 = vector.extract_strided_slice %63 {offsets = [0, 0], sizes = [32, 128], strides = [1, 1]} : vector<32x256xf32> to vector<32x128xf32>
    %65 = vector.extract_strided_slice %63 {offsets = [0, 128], sizes = [32, 128], strides = [1, 1]} : vector<32x256xf32> to vector<32x128xf32>
    %66 = arith.maximumf %64, %65 : vector<32x128xf32>
    %c64_i32 = arith.constant 64 : i32
    %67 = tpu.dynamic_rotate %66 by %c64_i32 dim 1 : vector<32x128xf32>, i32 -> vector<32x128xf32>
    %68 = arith.maximumf %66, %67 : vector<32x128xf32>
    %69 = arith.truncf %68 : vector<32x128xf32> to vector<32x128xbf16>
    %c0_40 = arith.constant 0 : index
    %c0_41 = arith.constant 0 : index
    %70 = vector.load %arg7[%c0_40, %c0_41] : memref<128x64xbf16, #tpu.memory_space<vmem>>, vector<128x64xbf16>
    %cst_42 = arith.constant dense<0.000000e+00> : vector<32x64xf32>
    %71 = tpu.matmul %69, %70, %cst_42 {dimension_numbers = #tpu.dot_dimension_numbers<[1], [0], [0], [1], [0, 0, 1, 1], [], []>} : vector<32x128xbf16>, vector<128x64xbf16>, vector<32x64xf32> -> vector<32x64xf32>
    %c0_43 = arith.constant 0 : index
    %c0_44 = arith.constant 0 : index
    %72 = vector.load %arg8[%c0_43, %c0_44] : memref<128x64xbf16, #tpu.memory_space<vmem>>, vector<128x64xbf16>
    %cst_45 = arith.constant dense<0.000000e+00> : vector<32x64xf32>
    %73 = tpu.matmul %2, %72, %cst_45 {dimension_numbers = #tpu.dot_dimension_numbers<[1], [0], [0], [1], [0, 0, 1, 1], [], []>} : vector<32x128xbf16>, vector<128x64xbf16>, vector<32x64xf32> -> vector<32x64xf32>
    %74 = arith.addf %71, %73 : vector<32x64xf32>
    %75 = vector.broadcast %7 : vector<1x64xf32> to vector<32x64xf32>
    %76 = arith.addf %74, %75 : vector<32x64xf32>
    %cst_46 = arith.constant 0.000000e+00 : f32
    %77 = vector.broadcast %cst_46 : f32 to vector<32x64xf32>
    %78 = arith.maximumf %76, %77 : vector<32x64xf32>
    %79 = arith.truncf %78 : vector<32x64xf32> to vector<32x64xbf16>
    %c0_47 = arith.constant 0 : index
    %c0_48 = arith.constant 0 : index
    %80 = vector.load %arg9[%c0_47, %c0_48] : memref<64x32xbf16, #tpu.memory_space<vmem>>, vector<64x32xbf16>
    %cst_49 = arith.constant dense<0.000000e+00> : vector<32x32xf32>
    %81 = tpu.matmul %79, %80, %cst_49 {dimension_numbers = #tpu.dot_dimension_numbers<[1], [0], [0], [1], [0, 0, 1, 1], [], []>} : vector<32x64xbf16>, vector<64x32xbf16>, vector<32x32xf32> -> vector<32x32xf32>
    %82 = vector.broadcast %8 : vector<1x32xf32> to vector<32x32xf32>
    %83 = arith.addf %81, %82 : vector<32x32xf32>
    %cst_50 = arith.constant 0.000000e+00 : f32
    %84 = vector.broadcast %cst_50 : f32 to vector<32x32xf32>
    %85 = arith.maximumf %83, %84 : vector<32x32xf32>
    %c0_51 = arith.constant 0 : index
    %c0_52 = arith.constant 0 : index
    %86 = vector.load %arg11[%c0_51, %c0_52] : memref<32x32xf32, #tpu.memory_space<vmem>>, vector<32x32xf32>
    tpu.vector_store %arg11[%c0_51, %c0_52], %85 {strides = array<i32>} : memref<32x32xf32, #tpu.memory_space<vmem>>, vector<32x32xf32>,
    return
  }
  func.func @transform_0(%arg0: i32) -> (i32, i32) {
    %c0_i32 = arith.constant 0 : i32
    %c0_i32_0 = arith.constant 0 : i32
    return %arg0, %c0_i32 : i32, i32
  }
  func.func @transform_1(%arg0: i32) -> (i32, i32) {
    %c0_i32 = arith.constant 0 : i32
    %c0_i32_0 = arith.constant 0 : i32
    %c0_i32_1 = arith.constant 0 : i32
    return %c0_i32, %c0_i32_0 : i32, i32
  }
  func.func @transform_2(%arg0: i32) -> (i32, i32) {
    %c0_i32 = arith.constant 0 : i32
    %c0_i32_0 = arith.constant 0 : i32
    %c0_i32_1 = arith.constant 0 : i32
    return %c0_i32, %c0_i32_0 : i32, i32
  }
  func.func @transform_3(%arg0: i32) -> (i32, i32) {
    %c0_i32 = arith.constant 0 : i32
    %c0_i32_0 = arith.constant 0 : i32
    %c0_i32_1 = arith.constant 0 : i32
    return %c0_i32, %c0_i32_0 : i32, i32
  }
  func.func @transform_4(%arg0: i32) -> (i32, i32) {
    %c0_i32 = arith.constant 0 : i32
    %c0_i32_0 = arith.constant 0 : i32
    %c0_i32_1 = arith.constant 0 : i32
    return %c0_i32, %c0_i32_0 : i32, i32
  }
  func.func @transform_5(%arg0: i32) -> (i32, i32) {
    %c0_i32 = arith.constant 0 : i32
    %c0_i32_0 = arith.constant 0 : i32
    %c0_i32_1 = arith.constant 0 : i32
    return %c0_i32, %c0_i32_0 : i32, i32
  }
  func.func @transform_6(%arg0: i32) -> (i32, i32) {
    %c0_i32 = arith.constant 0 : i32
    %c0_i32_0 = arith.constant 0 : i32
    %c0_i32_1 = arith.constant 0 : i32
    return %c0_i32, %c0_i32_0 : i32, i32
  }
  func.func @transform_7(%arg0: i32) -> (i32, i32) {
    %c0_i32 = arith.constant 0 : i32
    %c0_i32_0 = arith.constant 0 : i32
    %c0_i32_1 = arith.constant 0 : i32
    return %c0_i32, %c0_i32_0 : i32, i32
  }
  func.func @transform_8(%arg0: i32) -> (i32, i32) {
    %c0_i32 = arith.constant 0 : i32
    %c0_i32_0 = arith.constant 0 : i32
    %c0_i32_1 = arith.constant 0 : i32
    return %c0_i32, %c0_i32_0 : i32, i32
  }
  func.func @transform_9(%arg0: i32) -> (i32, i32) {
    %c0_i32 = arith.constant 0 : i32
    %c0_i32_0 = arith.constant 0 : i32
    %c0_i32_1 = arith.constant 0 : i32
    return %c0_i32, %c0_i32_0 : i32, i32
  }
  func.func @transform_10(%arg0: i32) -> (i32, i32) {
    %c0_i32 = arith.constant 0 : i32
    %c0_i32_0 = arith.constant 0 : i32
    return %arg0, %c0_i32 : i32, i32
  }
}

</mosaic_0001>

<bundles_post_ra>
// kernel: tpu_custom_call.1
= control target key start
LH: loop header
LB: loop body
LE: loop exit
PB: predicated region body
PF: predicated region fallthrough
CT: control target
= control target key end

     0   :  { %15 = vsyncpa [#allocation3], 0  ;;  %s3204_s0 = inlined_call_operand.vmem [shape: bf16[32,384], index: 0, kind: input, shape index: {}]   ;;  %s3205_s1 = inlined_call_operand.vmem [shape: bf16[128,256], index: 1, kind: input, shape index: {}]   ;;  %s3206_s2 = inlined_call_operand.hbm [shape: bf16[128,256], index: 2, kind: input, shape index: {}]   ;;  %s3207_s3 = inlined_call_operand.hbm [shape: bf16[256,256], index: 3, kind: input, shape index: {}]   ;;  %s3208_s4 = inlined_call_operand.hbm [shape: bf16[128,512], index: 4, kind: input, shape index: {}]   ;;  %s3209_s5 = inlined_call_operand.hbm [shape: bf16[256,256], index: 5, kind: input, shape index: {}]   ;;  %s3210_s6 = inlined_call_operand.vmem [shape: bf16[128,64], index: 6, kind: input, shape index: {}]   ;;  %s3211_s7 = inlined_call_operand.vmem [shape: bf16[128,64], index: 7, kind: input, shape index: {}]   ;;  %s3212_s8 = inlined_call_operand.vmem [shape: bf16[64,32], index: 8, kind: input, shape index: {}]   ;;  %s3213_s9 = inlined_call_operand.hbm [shape: f32[8,512], index: 9, kind: input, shape index: {}]   ;;  %s3214_s10 = inlined_call_operand.hbm [shape: f32[32,32], index: 10, kind: output, shape index: {}]  }
   0x1   :  { %16 = vsyncpa [#allocation6], 0 }
   0x2   :  { %17 = vsyncpa [#allocation9], 0 }
   0x3   :  { %18 = vsyncpa [#allocation4], 0  ;;  %s2515_s13 = smov [#allocation5]   ;;  %s2516_s15 = smov [#allocation8]  }
   0x4   :  { %s40_s14 = sshll.u32 %s2515_s13, 4  ;;  %s64_s16 = sshll.u32 %s2516_s15, 4  ;;  %s41_s14 = int_to_ptr.vmem [resolvable:$true] %s40_s14  ;;  %s65_s16 = int_to_ptr.vmem [resolvable:$true] %s64_s16 }
   0x5   :  { %s2395_s17 = scalar_lea.vmem %s41_s14, 4096  ;;  %p2400_p1 = scmp.lt.s32.totalorder %s41_s14, %s41_s14 }
   0x6   :  { %p2396_p0 = scmp.ne.s32.totalorder %s41_s14, %s2395_s17  ;;  %p2401_p2 = scmp.lt.s32.totalorder %s2395_s17, %s2395_s17 }
   0x8   :  { %p2402_p3 = por %p2401_p2, %p2400_p1 }
   0xa   :  { %p2403_p4 = pnand %p2402_p3, %p2396_p0 }
   0xc   :  { %2406 = shalt.err (!%p2403_p4)
}
   0xd   :  { %s2517_s18 = smov 128   ;;  %s2518_s19 = smov 8  }
   0xe   :  { %46 = dma.hbm_to_vmem [thread:$0]  %s3207_s3, 4096, %s41_s14, [#allocation6], %s2517_s18, %s2517_s18, %s2518_s19  }
   0xf   :  { %s2415_s22 = scalar_lea.vmem %s65_s16, 4096  ;;  %p2420_p6 = scmp.lt.s32.totalorder %s65_s16, %s65_s16 }
  0x10   :  { %p2416_p5 = scmp.ne.s32.totalorder %s65_s16, %s2415_s22  ;;  %p2421_p7 = scmp.lt.s32.totalorder %s2415_s22, %s2415_s22 }
  0x12   :  { %p2422_p8 = por %p2421_p7, %p2420_p6 }
  0x14   :  { %p2423_p9 = pnand %p2422_p8, %p2416_p5 }
  0x16   :  { %2426 = shalt.err (!%p2423_p9)
}
  0x17   :  { %70 = dma.hbm_to_vmem [thread:$0]  %s3209_s5, 4096, %s65_s16, [#allocation9], %s2517_s18, %s2517_s18, %s2518_s19  }
  0x18   :  { %s2519_s25 = smov [#allocation2]   ;;  %s2520_s27 = smov [#allocation7]  }
  0x19   :  { %s28_s26 = sshll.u32 %s2519_s25, 4  ;;  %s52_s28 = sshll.u32 %s2520_s27, 4  ;;  %s29_s26 = int_to_ptr.vmem [resolvable:$true] %s28_s26  ;;  %s53_s28 = int_to_ptr.vmem [resolvable:$true] %s52_s28 }
  0x1a   :  { %s2435_s3 = scalar_lea.vmem %s29_s26, 2048  ;;  %p2440_p11 = scmp.lt.s32.totalorder %s29_s26, %s29_s26 }
  0x1b   :  { %p2436_p10 = scmp.ne.s32.totalorder %s29_s26, %s2435_s3  ;;  %p2441_p12 = scmp.lt.s32.totalorder %s2435_s3, %s2435_s3 }
  0x1d   :  { %p2442_p13 = por %p2441_p12, %p2440_p11 }
  0x1f   :  { %p2443_p0 = pnand %p2442_p13, %p2436_p10 }
  0x21   :  { %2446 = shalt.err (!%p2443_p0)
}
  0x22   :  { %34 = dma.hbm_to_vmem [thread:$0]  %s3206_s2, 2048, %s29_s26, [#allocation3], %s2517_s18, %s2517_s18, %s2518_s19  }
  0x23   :  { %s2455_s5 = scalar_lea.vmem %s53_s28, 4096  ;;  %p2460_p2 = scmp.lt.s32.totalorder %s53_s28, %s53_s28 }
  0x24   :  { %p2456_p1 = scmp.ne.s32.totalorder %s53_s28, %s2455_s5  ;;  %p2461_p3 = scmp.lt.s32.totalorder %s2455_s5, %s2455_s5 }
  0x26   :  { %p2462_p4 = por %p2461_p3, %p2460_p2 }
  0x28   :  { %p2463_p5 = pnand %p2462_p4, %p2456_p1 }
  0x2a   :  { %2466 = shalt.err (!%p2463_p5)
}
  0x2b   :  { %s2521_s11 = smov 256   ;;  %s2522_s12 = smov 16  }
  0x2c   :  { %58 = dma.hbm_to_vmem [thread:$0]  %s3208_s4, 4096, %s53_s28, [#allocation6], %s2521_s11, %s2521_s11, %s2522_s12  }
  0x2d   :  { %s2523_s15 = smov [#allocation10]  }
  0x2e   :  { %s83_s16 = sshll.u32 %s2523_s15, 4  ;;  %s84_s16 = int_to_ptr.vmem [resolvable:$true] %s83_s16 }
  0x2f   :  { %s2475_s17 = scalar_lea.vmem %s84_s16, 512  ;;  %p2480_p7 = scmp.lt.s32.totalorder %s84_s16, %s84_s16 }
  0x30   :  { %p2476_p6 = scmp.ne.s32.totalorder %s84_s16, %s2475_s17  ;;  %p2481_p8 = scmp.lt.s32.totalorder %s2475_s17, %s2475_s17 }
  0x32   :  { %p2482_p9 = por %p2481_p8, %p2480_p7 }
  0x34   :  { %p2483_p10 = pnand %p2482_p9, %p2476_p6 }
  0x36   :  { %2486 = shalt.err (!%p2483_p10)
}
  0x37   :  { %86 = dma.hbm_to_vmem [thread:$0]  %s3213_s9, 512, %s84_s16, [#allocation9]  }
  0x38   :  { %2507 = dma.done.wait [#allocation3], 2048  }
  0x39   :  { %2508 = vsyncadd [#allocation3], 4294965248 }
  0x3a   :  { %2509 = dma.done.wait [#allocation6], 8192  }
  0x3b   :  { %2510 = vsyncadd [#allocation6], 4294959104 }
  0x3c   :  { %2511 = dma.done.wait [#allocation9], 4608  }
  0x3d   :  { %2512 = vsyncadd [#allocation9], 4294962688  ;;  %v3215_v0 = vmov 0   ;;  %v2169_v1 = vld [vmem:[%s3205_s1 + $0x74] ss:$8 sps:$4 sm:$0xff]   ;;  %vm1829_vm0 = vcmask 523264  }
  0x3e   :  { %275 = vmatprep.mubr.bf16.mxu0 %v3215_v0  ;;  %561 = vmatprep.mubr.bf16.mxu1 %v3215_v0  ;;  %v2171_v2 = vld [vmem:[%s3205_s1 + $0x70] ss:$8 sps:$4 sm:$0xff]   ;;  %v2172_v3 = vld [vmem:[%s3205_s1 + $0x64] ss:$8 sps:$4 sm:$0xff]   ;;  %v2174_v4 = vld [vmem:[%s3205_s1 + $0x60] ss:$8 sps:$4 sm:$0xff]  }
  0x3f   :  { %243 = vmatprep.subr.bf16.mxu0 %v2169_v1  ;;  %v2175_v5 = vld [vmem:[%s3205_s1 + $0x54] ss:$8 sps:$4 sm:$0xff]   ;;  %v2177_v6 = vld [vmem:[%s3205_s1 + $0x50] ss:$8 sps:$4 sm:$0xff]   ;;  %v2178_v7 = vld [vmem:[%s3205_s1 + $0x44] ss:$8 sps:$4 sm:$0xff]  }
  0x40   :  { %244 = vmatpush1.bf16.msra.mxu0 %v2171_v2  ;;  %v2180_v8 = vld [vmem:[%s3205_s1 + $0x40] ss:$8 sps:$4 sm:$0xff]   ;;  %v2181_v9 = vld [vmem:[%s3205_s1 + $0x34] ss:$8 sps:$4 sm:$0xff]   ;;  %v2183_v13 = vld [vmem:[%s3205_s1 + $0x30] ss:$8 sps:$4 sm:$0xff]  }
  0x41   :  { %245 = vmatprep.subr.bf16.mxu0 %v2172_v3  ;;  %v2195_v10 = vld [vmem:[#allocation7 + $0xe4] ss:$16 sps:$4 sm:$0xff]   ;;  %v2197_v11 = vld [vmem:[#allocation7 + $0xe0] ss:$16 sps:$4 sm:$0xff]   ;;  %v2687_v41 = vld [vmem:[%s3204_s0 + $0x1c] ss:$12 sps:$4 sm:$0xff]  }
  0x42   :  { %v2198_v12 = vld [vmem:[#allocation7 + $0xc4] ss:$16 sps:$4 sm:$0xff]   ;;  %529 = vmatprep.subr.bf16.mxu1 %v2195_v10  ;;  %v2200_v15 = vld [vmem:[#allocation7 + $0xc0] ss:$16 sps:$4 sm:$0xff]   ;;  %v2245_v53 = vld [vmem:[#allocation7 + $0xe8] ss:$16 sps:$4 sm:$0xff]  }
  0x43   :  { %v2184_v14 = vld [vmem:[%s3205_s1 + $0x24] ss:$8 sps:$4 sm:$0xff]   ;;  %530 = vmatpush1.bf16.msra.mxu1 %v2197_v11  ;;  %v2186_v17 = vld [vmem:[%s3205_s1 + $0x20] ss:$8 sps:$4 sm:$0xff]   ;;  %v2187_v18 = vld [vmem:[%s3205_s1 + $0x14] ss:$8 sps:$4 sm:$0xff]  }
  0x44   :  { %246 = vmatpush1.bf16.msra.mxu0 %v2174_v4  ;;  %531 = vmatprep.subr.bf16.mxu1 %v2198_v12  ;;  %v2201_v16 = vld [vmem:[#allocation7 + $0xa4] ss:$16 sps:$4 sm:$0xff]   ;;  %v2203_v19 = vld [vmem:[#allocation7 + $0xa0] ss:$16 sps:$4 sm:$0xff]   ;;  %v2247_v54 = vld [vmem:[#allocation7 + $0xec] ss:$16 sps:$4 sm:$0xff]  }
  0x45   :  { %247 = vmatprep.subr.bf16.mxu0 %v2175_v5  ;;  %v2204_v20 = vld [vmem:[#allocation7 + $0x84] ss:$16 sps:$4 sm:$0xff]   ;;  %v2189_v21 = vld [vmem:[%s3205_s1 + $0x10] ss:$8 sps:$4 sm:$0xff]   ;;  %v2192_v25 = vld [vmem:[%s3205_s1] ss:$8 sps:$4 sm:$0xff]  }
  0x46   :  { %v2190_v22 = vld [vmem:[%s3205_s1 + $0x4] ss:$8 sps:$4 sm:$0xff]   ;;  %v2206_v23 = vld [vmem:[#allocation7 + $0x80] ss:$16 sps:$4 sm:$0xff]   ;;  %v2663_v35 = vld [vmem:[#allocation2 + $0x74] ss:$8 sps:$4 sm:$0xff]  }
  0x47   :  { %532 = vmatpush1.bf16.msra.mxu1 %v2200_v15  ;;  %v2207_v24 = vld [vmem:[#allocation7 + $0x64] ss:$16 sps:$4 sm:$0xff]   ;;  %v2209_v26 = vld [vmem:[#allocation7 + $0x60] ss:$16 sps:$4 sm:$0xff]   ;;  %v2250_v55 = vld [vmem:[#allocation7 + $0xcc] ss:$16 sps:$4 sm:$0xff]  }
  0x48   :  { %248 = vmatpush1.bf16.msra.mxu0 %v2177_v6  ;;  %533 = vmatprep.subr.bf16.mxu1 %v2201_v16  ;;  %v2210_v27 = vld [vmem:[#allocation7 + $0x44] ss:$16 sps:$4 sm:$0xff]   ;;  %v2193_v28 = vld [vmem:[%s3204_s0] ss:$12 sps:$4 sm:$0xff]   ;;  %v2670_v37 = vld [vmem:[#allocation2 + $0x70] ss:$8 sps:$4 sm:$0xff]  }
  0x49   :  { %249 = vmatprep.subr.bf16.mxu0 %v2178_v7  ;;  %v2212_v29 = vld [vmem:[#allocation7 + $0x40] ss:$16 sps:$4 sm:$0xff]   ;;  %v2213_v30 = vld [vmem:[#allocation7 + $0x24] ss:$16 sps:$4 sm:$0xff]   ;;  %v2248_v56 = vld [vmem:[#allocation7 + $0xc8] ss:$16 sps:$4 sm:$0xff]  }
  0x4a   :  { %v2215_v31 = vld [vmem:[#allocation7 + $0x20] ss:$16 sps:$4 sm:$0xff]   ;;  %v2216_v32 = vld [vmem:[#allocation7 + $0x4] ss:$16 sps:$4 sm:$0xff]   ;;  %v2253_v57 = vld [vmem:[#allocation7 + $0xac] ss:$16 sps:$4 sm:$0xff]  }
  0x4b   :  { %534 = vmatpush1.bf16.msra.mxu1 %v2203_v19  ;;  %v2194_v33 = vld [vmem:[%s3204_s0 + $0x18] ss:$12 sps:$4 sm:$0xff]   ;;  %v2218_v34 = vld [vmem:[#allocation7] ss:$16 sps:$4 sm:$0xff]   ;;  %v2679_v40 = vld [vmem:[#allocation2 + $0x54] ss:$8 sps:$4 sm:$0xff]  }
  0x4c   :  { %250 = vmatpush1.bf16.msra.mxu0 %v2180_v8  ;;  %535 = vmatprep.subr.bf16.mxu1 %v2204_v20  ;;  %v2668_v36 = vld [vmem:[%s3204_s0 + $0x4] ss:$12 sps:$4 sm:$0xff]   ;;  %v2676_v39 = vld [vmem:[#allocation2 + $0x60] ss:$8 sps:$4 sm:$0xff]   ;;  %v2697_v45 = vld [vmem:[#allocation2 + $0x34] ss:$8 sps:$4 sm:$0xff]  }
  0x4d   :  { %251 = vmatprep.subr.bf16.mxu0 %v2181_v9  ;;  %v2672_v38 = vld [vmem:[#allocation2 + $0x64] ss:$8 sps:$4 sm:$0xff]   ;;  %v2689_v42 = vld [vmem:[#allocation2 + $0x50] ss:$8 sps:$4 sm:$0xff]   ;;  %v2695_v44 = vld [vmem:[#allocation2 + $0x40] ss:$8 sps:$4 sm:$0xff]  }
  0x4e   :  { %v2691_v43 = vld [vmem:[#allocation2 + $0x44] ss:$8 sps:$4 sm:$0xff]   ;;  %v2703_v46 = vld [vmem:[#allocation2 + $0x30] ss:$8 sps:$4 sm:$0xff]   ;;  %v2709_v48 = vld [vmem:[#allocation2 + $0x20] ss:$8 sps:$4 sm:$0xff]  }
  0x4f   :  { %536 = vmatpush1.bf16.msra.mxu1 %v2206_v23  ;;  %v2705_v47 = vld [vmem:[#allocation2 + $0x24] ss:$8 sps:$4 sm:$0xff]   ;;  %v2714_v49 = vld [vmem:[#allocation2 + $0x14] ss:$8 sps:$4 sm:$0xff]   ;;  %v2716_v50 = vld [vmem:[#allocation2 + $0x10] ss:$8 sps:$4 sm:$0xff]  }
  0x50   :  { %252 = vmatpush1.bf16.msra.mxu0 %v2183_v13  ;;  %537 = vmatprep.subr.bf16.mxu1 %v2207_v24  ;;  %v2720_v51 = vld [vmem:[#allocation2 + $0x4] ss:$8 sps:$4 sm:$0xff]   ;;  %v2722_v52 = vld [vmem:[#allocation2] ss:$8 sps:$4 sm:$0xff]   ;;  %v2726_v6 = vld [vmem:[#allocation5 + $0x74] ss:$8 sps:$4 sm:$0xff]  }
  0x51   :  { %253 = vmatprep.subr.bf16.mxu0 %v2184_v14  ;;  %v2251_v58 = vld [vmem:[#allocation7 + $0xa8] ss:$16 sps:$4 sm:$0xff]   ;;  %v2256_v59 = vld [vmem:[#allocation7 + $0x8c] ss:$16 sps:$4 sm:$0xff]   ;;  %vm1889_vm1 = vcmask 261120  }
  0x52   :  { %v2254_v60 = vld [vmem:[#allocation7 + $0x88] ss:$16 sps:$4 sm:$0xff]   ;;  %v2259_v61 = vld [vmem:[#allocation7 + $0x6c] ss:$16 sps:$4 sm:$0xff]  }
  0x53   :  { %538 = vmatpush1.bf16.msra.mxu1 %v2209_v26  ;;  %v2257_v62 = vld [vmem:[#allocation7 + $0x68] ss:$16 sps:$4 sm:$0xff]   ;;  %v2262_v63 = vld [vmem:[#allocation7 + $0x4c] ss:$16 sps:$4 sm:$0xff]  }
  0x54   :  { %254 = vmatpush1.bf16.msra.mxu0 %v2186_v17  ;;  %539 = vmatprep.subr.bf16.mxu1 %v2210_v27  ;;  %v2260_v1 = vld [vmem:[#allocation7 + $0x48] ss:$16 sps:$4 sm:$0xff]   ;;  %v2265_v2 = vld [vmem:[#allocation7 + $0x2c] ss:$16 sps:$4 sm:$0xff]  }
  0x55   :  { %255 = vmatprep.subr.bf16.mxu0 %v2187_v18  ;;  %v2263_v3 = vld [vmem:[#allocation7 + $0x28] ss:$16 sps:$4 sm:$0xff]   ;;  %v2268_v4 = vld [vmem:[#allocation7 + $0xc] ss:$16 sps:$4 sm:$0xff]  }
  0x56   :  { %v2266_v5 = vld [vmem:[#allocation7 + $0x8] ss:$16 sps:$4 sm:$0xff]   ;;  %v2731_v8 = vld [vmem:[#allocation5 + $0x64] ss:$8 sps:$4 sm:$0xff]   ;;  %v2739_v10 = vld [vmem:[#allocation5 + $0x54] ss:$8 sps:$4 sm:$0xff]  }
  0x57   :  { %540 = vmatpush1.bf16.msra.mxu1 %v2212_v29  ;;  %v2728_v7 = vld [vmem:[#allocation5 + $0x70] ss:$8 sps:$4 sm:$0xff]   ;;  %3260 = vst [vmem:[#allocation17_spill] sm:$0xff] %v2731_v8  ;;  %v2735_v9 = vld [vmem:[#allocation5 + $0x60] ss:$8 sps:$4 sm:$0xff]   ;;  %3262 = vst [vmem:[#allocation19_spill] sm:$0xff] %v2739_v10 }
  0x58   :  { %256 = vmatpush1.bf16.msra.mxu0 %v2189_v21  ;;  %541 = vmatprep.subr.bf16.mxu1 %v2213_v30  ;;  %3259 = vst [vmem:[#allocation16_spill] sm:$0xff] %v2728_v7  ;;  %3261 = vst [vmem:[#allocation18_spill] sm:$0xff] %v2735_v9  ;;  %v2742_v11 = vld [vmem:[#allocation5 + $0x50] ss:$8 sps:$4 sm:$0xff]   ;;  %v2745_v12 = vld [vmem:[#allocation5 + $0x44] ss:$8 sps:$4 sm:$0xff]  }
  0x59   :  { %257 = vmatprep.subr.bf16.mxu0 %v2190_v22  ;;  %3263 = vst [vmem:[#allocation20_spill] sm:$0xff] %v2742_v11  ;;  %3264 = vst [vmem:[#allocation21_spill] sm:$0xff] %v2745_v12  ;;  %v2749_v13 = vld [vmem:[#allocation5 + $0x40] ss:$8 sps:$4 sm:$0xff]   ;;  %v2752_v14 = vld [vmem:[#allocation5 + $0x34] ss:$8 sps:$4 sm:$0xff]  }
  0x5a   :  { %3265 = vst [vmem:[#allocation22_spill] sm:$0xff] %v2749_v13  ;;  %3266 = vst [vmem:[#allocation23_spill] sm:$0xff] %v2752_v14  ;;  %v2755_v15 = vld [vmem:[#allocation5 + $0x30] ss:$8 sps:$4 sm:$0xff]   ;;  %v2758_v16 = vld [vmem:[#allocation5 + $0x24] ss:$8 sps:$4 sm:$0xff]  }
  0x5b   :  { %542 = vmatpush1.bf16.msra.mxu1 %v2215_v31  ;;  %3267 = vst [vmem:[#allocation24_spill] sm:$0xff] %v2755_v15  ;;  %3268 = vst [vmem:[#allocation25_spill] sm:$0xff] %v2758_v16  ;;  %v2761_v17 = vld [vmem:[#allocation5 + $0x20] ss:$8 sps:$4 sm:$0xff]   ;;  %v2764_v18 = vld [vmem:[#allocation5 + $0x14] ss:$8 sps:$4 sm:$0xff]  }
  0x5c   :  { %258 = vmatpush1.bf16.msra.mxu0 %v2192_v25  ;;  %543 = vmatprep.subr.bf16.mxu1 %v2216_v32  ;;  %3269 = vst [vmem:[#allocation26_spill] sm:$0xff] %v2761_v17  ;;  %3270 = vst [vmem:[#allocation27_spill] sm:$0xff] %v2764_v18  ;;  %v2767_v19 = vld [vmem:[#allocation5 + $0x10] ss:$8 sps:$4 sm:$0xff]   ;;  %v2770_v20 = vld [vmem:[#allocation5 + $0x4] ss:$8 sps:$4 sm:$0xff]   ;;  %v141_v32 = vlaneseq }
  0x5d   :  { %582 = vmatprep.subr.bf16.mxu0 %v2247_v54  ;;  %3271 = vst [vmem:[#allocation28_spill] sm:$0xff] %v2767_v19  ;;  %3272 = vst [vmem:[#allocation29_spill] sm:$0xff] %v2770_v20  ;;  %v2773_v21 = vld [vmem:[#allocation5] ss:$8 sps:$4 sm:$0xff]   ;;  %v2776_v22 = vld [vmem:[#allocation5 + $0xf4] ss:$8 sps:$4 sm:$0xff]  }
  0x5e   :  { %3273 = vst [vmem:[#allocation30_spill] sm:$0xff] %v2773_v21  ;;  %3274 = vst [vmem:[#allocation31_spill] sm:$0xff] %v2776_v22  ;;  %v2779_v23 = vld [vmem:[#allocation5 + $0xf0] ss:$8 sps:$4 sm:$0xff]   ;;  %v2782_v24 = vld [vmem:[#allocation5 + $0xe4] ss:$8 sps:$4 sm:$0xff]  }
  0x5f   :  { %276 = vmatmul.mubr.bf16.vlgmr.msra.gmra.mxu0 %v2193_v28  ;;  %544 = vmatpush1.bf16.msra.mxu1 %v2218_v34  ;;  %3275 = vst [vmem:[#allocation32_spill] sm:$0xff] %v2779_v23  ;;  %3276 = vst [vmem:[#allocation33_spill] sm:$0xff] %v2782_v24  ;;  %v2785_v25 = vld [vmem:[#allocation5 + $0xe0] ss:$8 sps:$4 sm:$0xff]   ;;  %v2788_v26 = vld [vmem:[#allocation5 + $0xd4] ss:$8 sps:$4 sm:$0xff]  }
  0x60   :  { %285 = vmatprep.mubr.bf16.mxu0 %v3215_v0  ;;  %744 = vmatprep.subr.bf16.mxu1 %v2663_v35  ;;  %3277 = vst [vmem:[#allocation34_spill] sm:$0xff] %v2785_v25  ;;  %3278 = vst [vmem:[#allocation35_spill] sm:$0xff] %v2788_v26  ;;  %v2791_v27 = vld [vmem:[#allocation5 + $0xd0] ss:$8 sps:$4 sm:$0xff]   ;;  %v2794_v28 = vld [vmem:[#allocation5 + $0xc4] ss:$8 sps:$4 sm:$0xff]  }
  0x61   :  { %583 = vmatpush1.bf16.msra.mxu0 %v2245_v53  ;;  %3279 = vst [vmem:[#allocation36_spill] sm:$0xff] %v2791_v27  ;;  %3280 = vst [vmem:[#allocation37_spill] sm:$0xff] %v2794_v28  ;;  %v2797_v29 = vld [vmem:[#allocation5 + $0xc0] ss:$8 sps:$4 sm:$0xff]   ;;  %v2800_v30 = vld [vmem:[#allocation5 + $0xb4] ss:$8 sps:$4 sm:$0xff]  }
  0x62   :  { %562 = vmatmul.mubr.bf16.vlgmr.msra.gmra.mxu1 %v2668_v36  ;;  %584 = vmatprep.subr.bf16.mxu0 %v2250_v55  ;;  %3281 = vst [vmem:[#allocation38_spill] sm:$0xff] %v2797_v29  ;;  %3282 = vst [vmem:[#allocation39_spill] sm:$0xff] %v2800_v30  ;;  %v2803_v31 = vld [vmem:[#allocation5 + $0xb0] ss:$8 sps:$4 sm:$0xff]  }
  0x63   :  { %745 = vmatpush1.bf16.msra.mxu1 %v2670_v37  ;;  %571 = vmatprep.mubr.bf16.mxu1 %v3215_v0  ;;  %3283 = vst [vmem:[#allocation40_spill] sm:$0xff] %v2803_v31 }
  0x64   :  { %746 = vmatprep.subr.bf16.mxu1 %v2672_v38 }
  0x65   :  { %585 = vmatpush1.bf16.msra.mxu0 %v2248_v56 }
  0x66   :  { %586 = vmatprep.subr.bf16.mxu0 %v2253_v57 }
  0x67   :  { %286 = vmatmul.mubr.bf16.gmra.mxu0 %v2194_v33  ;;  %747 = vmatpush1.bf16.msra.mxu1 %v2676_v39  ;;  %v2807_v33 = vshrl.u32 %v141_v32, 7 }
  0x68   :  { %614 = vmatprep.mubr.bf16.mxu0 %v3215_v0  ;;  %748 = vmatprep.subr.bf16.mxu1 %v2679_v40 }
  0x69   :  { %587 = vmatpush1.bf16.msra.mxu0 %v2251_v58  ;;  %3284 = vst [vmem:[#allocation41_spill] sm:$0xff] %v2807_v33  ;;  %v2810_v34 = vsub.s32 0, %v2807_v33 }
  0x6a   :  { %572 = vmatmul.mubr.bf16.gmra.mxu1 %v2687_v41  ;;  %588 = vmatprep.subr.bf16.mxu0 %v2256_v59 }
  0x6b   :  { %749 = vmatpush1.bf16.msra.mxu1 %v2689_v42  ;;  %776 = vmatprep.mubr.bf16.mxu1 %v3215_v0  ;;  %3285 = vst [vmem:[#allocation42_spill] sm:$0xff] %v2810_v34 }
  0x6c   :  { %750 = vmatprep.subr.bf16.mxu1 %v2691_v43 }
  0x6d   :  { %589 = vmatpush1.bf16.msra.mxu0 %v2254_v60 }
  0x6e   :  { %590 = vmatprep.subr.bf16.mxu0 %v2259_v61 }
  0x6f   :  { %751 = vmatpush1.bf16.msra.mxu1 %v2695_v44 }
  0x70   :  { %752 = vmatprep.subr.bf16.mxu1 %v2697_v45 }
  0x71   :  { %591 = vmatpush1.bf16.msra.mxu0 %v2257_v62 }
  0x72   :  { %592 = vmatprep.subr.bf16.mxu0 %v2262_v63 }
  0x73   :  { %753 = vmatpush1.bf16.msra.mxu1 %v2703_v46 }
  0x74   :  { %754 = vmatprep.subr.bf16.mxu1 %v2705_v47 }
  0x75   :  { %593 = vmatpush1.bf16.msra.mxu0 %v2260_v1 }
  0x76   :  { %594 = vmatprep.subr.bf16.mxu0 %v2265_v2 }
  0x77   :  { %755 = vmatpush1.bf16.msra.mxu1 %v2709_v48 }
  0x78   :  { %756 = vmatprep.subr.bf16.mxu1 %v2714_v49 }
  0x79   :  { %595 = vmatpush1.bf16.msra.mxu0 %v2263_v3 }
  0x7a   :  { %596 = vmatprep.subr.bf16.mxu0 %v2268_v4 }
  0x7b   :  { %757 = vmatpush1.bf16.msra.mxu1 %v2716_v50 }
  0x7c   :  { %758 = vmatprep.subr.bf16.mxu1 %v2720_v51 }
  0x7d   :  { %597 = vmatpush1.bf16.msra.mxu0 %v2266_v5 }
  0x7e   :  { %1001 = vmatprep.subr.bf16.mxu0 %v2726_v6 }
  0x7f   :  { %759 = vmatpush1.bf16.msra.mxu1 %v2722_v52 }
  0x80   :  { %615 = vmatmul.mubr.bf16.vlgmr.msra.gmra.mxu0 %v2668_v36  ;;  %v115_v36 = vld [vmem:[#allocation10] ss:$8 sm:$0x3] }
  0x81   :  { %1002 = vmatpush1.bf16.msra.mxu0 %v2728_v7  ;;  %624 = vmatprep.mubr.bf16.mxu0 %v3215_v0  ;;  %v144_v53 = vrot.slane %v115_v36, %v2810_v34  ;;  %v2821_v0 = vld [vmem:[#allocation10 + $0x2] ss:$8 sm:$0xf] }
  0x82   :  { %1003 = vmatprep.subr.bf16.mxu0 %v2731_v8  ;;  %3287 = vst [vmem:[#allocation44_spill] sm:$0xff] %v2821_v0 }
  0x85   :  { %1004 = vmatpush1.bf16.msra.mxu0 %v2735_v9 }
  0x86   :  { %1005 = vmatprep.subr.bf16.mxu0 %v2739_v10 }
  0x88   :  { %625 = vmatmul.mubr.bf16.gmra.mxu0 %v2687_v41  ;;  %v2813_v41 = vsub.s32 1, %v2807_v33 }
  0x89   :  { %1006 = vmatpush1.bf16.msra.mxu0 %v2742_v11 }
  0x8a   :  { %1007 = vmatprep.subr.bf16.mxu0 %v2745_v12  ;;  %3286 = vst [vmem:[#allocation43_spill] sm:$0xff] %v2813_v41  ;;  %v2817_v55 = vrot.slane %v115_v36, %v2813_v41  ;;  %v117_v12 = vld [vmem:[#allocation10 + $0x1] ss:$8 sm:$0x3] }
  0x8b   :  { %v2949_v10 = vrot.slane %v117_v12, %v2813_v41  ;;  %v2952_v9 = vrot.slane %v117_v12, %v2810_v34 }
  0x8d   :  { %1008 = vmatpush1.bf16.msra.mxu0 %v2749_v13 }
  0x8e   :  { %1009 = vmatprep.subr.bf16.mxu0 %v2752_v14 }
  0x91   :  { %1010 = vmatpush1.bf16.msra.mxu0 %v2755_v15  ;;  %v2940_v15 = vld [vmem:[#allocation8 + $0xb0] ss:$8 sps:$4 sm:$0xff]  }
  0x92   :  { %1011 = vmatprep.subr.bf16.mxu0 %v2758_v16  ;;  %v2937_v16 = vld [vmem:[#allocation8 + $0xb4] ss:$8 sps:$4 sm:$0xff]   ;;  %3304 = vst [vmem:[#allocation60_spill] sm:$0xff] %v2940_v15 }
  0x93   :  { %3303 = vst [vmem:[#allocation59_spill] sm:$0xff] %v2937_v16 }
  0x95   :  { %1012 = vmatpush1.bf16.msra.mxu0 %v2761_v17  ;;  %v2934_v17 = vld [vmem:[#allocation8 + $0xc0] ss:$8 sps:$4 sm:$0xff]  }
  0x96   :  { %1013 = vmatprep.subr.bf16.mxu0 %v2764_v18  ;;  %v2931_v18 = vld [vmem:[#allocation8 + $0xc4] ss:$8 sps:$4 sm:$0xff]   ;;  %3302 = vst [vmem:[#allocation58_spill] sm:$0xff] %v2934_v17 }
  0x99   :  { %1014 = vmatpush1.bf16.msra.mxu0 %v2767_v19  ;;  %v2928_v19 = vld [vmem:[#allocation8 + $0xd0] ss:$8 sps:$4 sm:$0xff]  }
  0x9a   :  { %1015 = vmatprep.subr.bf16.mxu0 %v2770_v20  ;;  %v2925_v20 = vld [vmem:[#allocation8 + $0xd4] ss:$8 sps:$4 sm:$0xff]  }
  0x9d   :  { %1016 = vmatpush1.bf16.msra.mxu0 %v2773_v21  ;;  %v2922_v21 = vld [vmem:[#allocation8 + $0xe0] ss:$8 sps:$4 sm:$0xff]  }
  0x9e   :  { %1017 = vmatprep.subr.bf16.mxu0 %v2776_v22  ;;  %v2919_v22 = vld [vmem:[#allocation8 + $0xe4] ss:$8 sps:$4 sm:$0xff]  }
  0xa1   :  { %1018 = vmatpush2.bf16.msra.mxu0 %v2779_v23  ;;  %v2916_v23 = vld [vmem:[#allocation8 + $0xf0] ss:$8 sps:$4 sm:$0xff]  }
  0xa2   :  { %1019 = vmatprep.subr.bf16.mxu0 %v2782_v24  ;;  %v2913_v24 = vld [vmem:[#allocation8 + $0xf4] ss:$8 sps:$4 sm:$0xff]  }
  0xa5   :  { %1020 = vmatpush2.bf16.msra.mxu0 %v2785_v25  ;;  %v2910_v25 = vld [vmem:[#allocation8] ss:$8 sps:$4 sm:$0xff]  }
  0xa6   :  { %1021 = vmatprep.subr.bf16.mxu0 %v2788_v26  ;;  %v2907_v26 = vld [vmem:[#allocation8 + $0x4] ss:$8 sps:$4 sm:$0xff]  }
  0xa9   :  { %1022 = vmatpush2.bf16.msra.mxu0 %v2791_v27  ;;  %v2904_v27 = vld [vmem:[#allocation8 + $0x10] ss:$8 sps:$4 sm:$0xff]  }
  0xaa   :  { %1023 = vmatprep.subr.bf16.mxu0 %v2794_v28  ;;  %v2901_v28 = vld [vmem:[#allocation8 + $0x14] ss:$8 sps:$4 sm:$0xff]  }
  0xad   :  { %1024 = vmatpush2.bf16.msra.mxu0 %v2797_v29  ;;  %v2898_v29 = vld [vmem:[#allocation8 + $0x20] ss:$8 sps:$4 sm:$0xff]  }
  0xae   :  { %1025 = vmatprep.subr.bf16.mxu0 %v2800_v30  ;;  %v2895_v30 = vld [vmem:[#allocation8 + $0x24] ss:$8 sps:$4 sm:$0xff]  }
  0xb1   :  { %1026 = vmatpush2.bf16.msra.mxu0 %v2803_v31 }
 0x11f   :  { %v277_v54 = vpop.f32.mrf.mxu0 }
 0x120   :  { %v278_v57 = vadd.f32 %v277_v54, %v144_v53 }
 0x121   :  { %v279_v56 = vpop.f32.mrf.mxu0 }
 0x122   :  { %v280_v59 = vadd.f32 %v279_v56, %v2817_v55  ;;  %v296_v62 = vmax.f32 %v278_v57, 0.0  ;;  %v3288_v56 = vmov 0   ;;  %v2830_v57 = vrot.slane %v2821_v0, %v2813_v41 }
 0x123   :  { %v281_v58 = vpop.f32.mrf.mxu0 }
 0x124   :  { %v282_v60 = vadd.f32 %v281_v58, %v144_v53  ;;  %v297_v3 = vmax.f32 %v280_v59, 0.0  ;;  %3289 = vst [vmem:[#allocation45_spill] sm:$0xff] %v2830_v57  ;;  %v2832_v59 = vpop.f32.mrf.mxu1 }
 0x125   :  { %v283_v61 = vpop.f32.mrf.mxu0  ;;  %3290 = vst [vmem:[#allocation46_spill] sm:$0xff] %v2832_v59 }
 0x126   :  { %v298_v63 = vmax.f32 %v282_v60, 0.0  ;;  %v284_v1 = vadd.f32 %v283_v61, %v2817_v55 }
 0x127   :  { %v287_v2 = vpop.f32.mrf.mxu0 }
 0x128   :  { %v635_v4 = vpack.c.bf16 %v298_v63, %v296_v62  ;;  %v299_v5 = vmax.f32 %v284_v1, 0.0  ;;  %v288_v32 = vadd.f32 %v287_v2, %v144_v53  ;;  %v565_v62 = vpop.f32.mrf.mxu1 }
 0x129   :  { %v2823_v36 = vpop.f32.mrf.mxu0  ;;  %v2835_v63 = vadd.f32 %v565_v62, %v2830_v57  ;;  %v2866_v62 = vld [vmem:[#allocation8 + $0x70] ss:$8 sps:$4 sm:$0xff]  }
 0x12a   :  { %v2825_v33 = vpack.c.bf16 %v299_v5, %v297_v3  ;;  %777 = vmatmul.mubr.bf16.vlgmr.msra.gmra.mxu1 %v635_v4  ;;  %v300_v58 = vmax.f32 %v288_v32, 0.0  ;;  %v2837_v2 = vpop.f32.mrf.mxu1  ;;  %v2847_v32 = vld [vmem:[#allocation5 + $0xa4] ss:$8 sps:$4 sm:$0xff]  }
 0x12b   :  { %v291_v54 = vpop.f32.mrf.mxu0  ;;  %786 = vmatprep.mubr.bf16.mxu1 %v3288_v56  ;;  %3291 = vst [vmem:[#allocation47_spill] sm:$0xff] %v2835_v63  ;;  %3292 = vst [vmem:[#allocation48_spill] sm:$0xff] %v2837_v2  ;;  %1027 = vmatprep.subr.bf16.mxu0 %v2847_v32 }
 0x12c   :  { %v292_v60 = vadd.f32 %v291_v54, %v144_v53  ;;  %v569_v3 = vpop.f32.mrf.mxu1  ;;  %3296 = vst [vmem:[#allocation52_spill] sm:$0xff] %v2847_v32  ;;  %v2849_v54 = vld [vmem:[#allocation5 + $0xa0] ss:$8 sps:$4 sm:$0xff]   ;;  %v2892_v32 = vld [vmem:[#allocation8 + $0x30] ss:$8 sps:$4 sm:$0xff]  }
 0x12d   :  { %v2840_v4 = vadd.f32 %v569_v3, %v2830_v57  ;;  %3297 = vst [vmem:[#allocation53_spill] sm:$0xff] %v2849_v54  ;;  %1028 = vmatpush2.bf16.msra.mxu0 %v2849_v54  ;;  %v2870_v3 = vld [vmem:[#allocation8 + $0x64] ss:$8 sps:$4 sm:$0xff]   ;;  %v2889_v54 = vld [vmem:[#allocation8 + $0x34] ss:$8 sps:$4 sm:$0xff]  }
 0x12e   :  { %v302_v61 = vmax.f32 %v292_v60, 0.0  ;;  %v2842_v5 = vpop.f32.mrf.mxu1  ;;  %v2855_v60 = vld [vmem:[#allocation5 + $0x90] ss:$8 sps:$4 sm:$0xff]  }
 0x12f   :  { %3293 = vst [vmem:[#allocation49_spill] sm:$0xff] %v2840_v4  ;;  %3294 = vst [vmem:[#allocation50_spill] sm:$0xff] %v2842_v5 }
 0x130   :  { %v636_v1 = vpack.c.bf16 %v302_v61, %v300_v58  ;;  %v575_v31 = vpop.f32.mrf.mxu1  ;;  %v2853_v58 = vld [vmem:[#allocation5 + $0x94] ss:$8 sps:$4 sm:$0xff]   ;;  %3299 = vst [vmem:[#allocation55_spill] sm:$0xff] %v2855_v60  ;;  %v2859_v61 = vld [vmem:[#allocation5 + $0x84] ss:$8 sps:$4 sm:$0xff]  }
 0x131   :  { %v2845_v53 = vadd.f32 %v575_v31, %v2830_v57  ;;  %3298 = vst [vmem:[#allocation54_spill] sm:$0xff] %v2853_v58  ;;  %1029 = vmatprep.subr.bf16.mxu0 %v2853_v58  ;;  %3300 = vst [vmem:[#allocation56_spill] sm:$0xff] %v2859_v61  ;;  %v2861_v31 = vld [vmem:[#allocation5 + $0x80] ss:$8 sps:$4 sm:$0xff]   ;;  %v2877_v58 = vld [vmem:[#allocation8 + $0x54] ss:$8 sps:$4 sm:$0xff]  }
 0x132   :  { %787 = vmatmul.mubr.bf16.gmra.mxu1 %v636_v1  ;;  %1030 = vmatpush2.bf16.msra.mxu0 %v2855_v60  ;;  %3301 = vst [vmem:[#allocation57_spill] sm:$0xff] %v2861_v31  ;;  %v2868_v1 = vld [vmem:[#allocation8 + $0x74] ss:$8 sps:$4 sm:$0xff]   ;;  %v2874_v60 = vld [vmem:[#allocation8 + $0x60] ss:$8 sps:$4 sm:$0xff]   ;;  %v2944_v14 = vpop.f32.mrf.mxu1 }
 0x133   :  { %3295 = vst [vmem:[#allocation51_spill] sm:$0xff] %v2845_v53  ;;  %1031 = vmatprep.subr.bf16.mxu0 %v2859_v61  ;;  %1269 = vmatprep.subr.bf16.mxu1 %v2868_v1  ;;  %v2886_v61 = vld [vmem:[#allocation8 + $0x40] ss:$8 sps:$4 sm:$0xff]   ;;  %3305 = vst [vmem:[#allocation61_spill] sm:$0xff] %v2944_v14 }
 0x134   :  { %1270 = vmatpush1.bf16.msra.mxu1 %v2866_v62  ;;  %v2946_v13 = vpop.f32.mrf.mxu1 }
 0x135   :  { %1271 = vmatprep.subr.bf16.mxu1 %v2870_v3  ;;  %3306 = vst [vmem:[#allocation62_spill] sm:$0xff] %v2946_v13 }
 0x136   :  { %1032 = vmatpush2.bf16.msra.mxu0 %v2861_v31  ;;  %v2880_v31 = vld [vmem:[#allocation8 + $0x50] ss:$8 sps:$4 sm:$0xff]  }
 0x137   :  { %1332 = vmatprep.subr.bf16.mxu0 %v2663_v35  ;;  %v2883_v35 = vld [vmem:[#allocation8 + $0x44] ss:$8 sps:$4 sm:$0xff]  }
 0x138   :  { %1272 = vmatpush1.bf16.msra.mxu1 %v2874_v60 }
 0x139   :  { %1273 = vmatprep.subr.bf16.mxu1 %v2877_v58 }
 0x13c   :  { %1274 = vmatpush1.bf16.msra.mxu1 %v2880_v31 }
 0x13d   :  { %1275 = vmatprep.subr.bf16.mxu1 %v2883_v35 }
 0x140   :  { %1276 = vmatpush1.bf16.msra.mxu1 %v2886_v61 }
 0x141   :  { %1277 = vmatprep.subr.bf16.mxu1 %v2889_v54 }
 0x144   :  { %1278 = vmatpush1.bf16.msra.mxu1 %v2892_v32 }
 0x145   :  { %1279 = vmatprep.subr.bf16.mxu1 %v2895_v30 }
 0x148   :  { %1280 = vmatpush1.bf16.msra.mxu1 %v2898_v29 }
 0x149   :  { %1281 = vmatprep.subr.bf16.mxu1 %v2901_v28 }
 0x14c   :  { %1282 = vmatpush1.bf16.msra.mxu1 %v2904_v27 }
 0x14d   :  { %1283 = vmatprep.subr.bf16.mxu1 %v2907_v26 }
 0x150   :  { %1284 = vmatpush1.bf16.msra.mxu1 %v2910_v25 }
 0x151   :  { %1285 = vmatprep.subr.bf16.mxu1 %v2913_v24 }
 0x154   :  { %1286 = vmatpush2.bf16.msra.mxu1 %v2916_v23 }
 0x155   :  { %1287 = vmatprep.subr.bf16.mxu1 %v2919_v22 }
 0x158   :  { %1288 = vmatpush2.bf16.msra.mxu1 %v2922_v21 }
 0x159   :  { %1289 = vmatprep.subr.bf16.mxu1 %v2925_v20 }
 0x15c   :  { %1290 = vmatpush2.bf16.msra.mxu1 %v2928_v19 }
 0x15d   :  { %1291 = vmatprep.subr.bf16.mxu1 %v2931_v18 }
 0x160   :  { %1292 = vmatpush2.bf16.msra.mxu1 %v2934_v17 }
 0x161   :  { %1293 = vmatprep.subr.bf16.mxu1 %v2937_v16 }
 0x164   :  { %1294 = vmatpush2.bf16.msra.mxu1 %v2940_v15 }
 0x1ea   :  { %v778_v11 = vpop.f32.mrf.mxu1 }
 0x1eb   :  { %v779_v5 = vadd.f32 %v778_v11, %v2952_v9 }
 0x1ec   :  { %v780_v8 = vpop.f32.mrf.mxu1 }
 0x1ed   :  { %v781_v53 = vadd.f32 %v780_v8, %v2949_v10  ;;  %v797_v41 = vmax.f32 %v779_v5, 0.0 }
 0x1ee   :  { %v782_v7 = vpop.f32.mrf.mxu1 }
 0x1ef   :  { %v783_v57 = vadd.f32 %v782_v7, %v2952_v9  ;;  %v798_v2 = vmax.f32 %v781_v53, 0.0 }
 0x1f0   :  { %v784_v4 = vpop.f32.mrf.mxu1 }
 0x1f1   :  { %v785_v14 = vadd.f32 %v784_v4, %v2949_v10  ;;  %v799_v13 = vmax.f32 %v783_v57, 0.0 }
 0x1f2   :  { %v788_v63 = vpop.f32.mrf.mxu1 }
 0x1f3   :  { %v800_v59 = vmax.f32 %v785_v14, 0.0  ;;  %v789_v0 = vadd.f32 %v788_v63, %v2952_v9  ;;  %v805_v16 = vpack.c.bf16 %v799_v13, %v797_v41 }
 0x1f4   :  { %v790_v12 = vpop.f32.mrf.mxu1 }
 0x1f5   :  { %v806_v34 = vpack.c.bf16 %v800_v59, %v798_v2  ;;  %v791_v15 = vadd.f32 %v790_v12, %v2949_v10  ;;  %v801_v11 = vmax.f32 %v789_v0, 0.0  ;;  %v293_v0 = vpop.f32.mrf.mxu0  ;;  %v3315_v2 = vld [vmem:[#allocation49_spill] sm:$0xff] }
 0x1f6   :  { %v792_v8 = vpop.f32.mrf.mxu1 }
 0x1f7   :  { %v793_v7 = vadd.f32 %v792_v8, %v2952_v9  ;;  %1033 = vmatprep.mubr.bf16.mxu0 %v806_v34  ;;  %v802_v4 = vmax.f32 %v791_v15, 0.0 }
 0x1f8   :  { %v794_v17 = vpop.f32.mrf.mxu1  ;;  %1034 = vmatmul.mubr.bf16.vlgmr.msra.gmra.mxu0 %v805_v16 }
 0x1f9   :  { %v803_v57 = vmax.f32 %v793_v7, 0.0  ;;  %v795_v53 = vadd.f32 %v794_v17, %v2949_v10  ;;  %1333 = vmatpush1.bf16.msra.mxu0 %v2670_v37  ;;  %v290_v37 = vadd.f32 %v2823_v36, %v2817_v55  ;;  %v3318_v7 = vld [vmem:[#allocation45_spill] sm:$0xff] }
 0x1fa   :  { %1334 = vmatprep.subr.bf16.mxu0 %v2672_v38  ;;  %v294_v38 = vadd.f32 %v293_v0, %v2817_v55 }
 0x1fb   :  { %v804_v14 = vmax.f32 %v795_v53, 0.0  ;;  %v807_v59 = vpack.c.bf16 %v803_v57, %v801_v11  ;;  %v3319_v11 = vld [vmem:[#allocation62_spill] sm:$0xff]  ;;  %v3320_v57 = vld [vmem:[#allocation51_spill] sm:$0xff] }
 0x1fd   :  { %v808_v63 = vpack.c.bf16 %v804_v14, %v802_v4  ;;  %1335 = vmatpush1.bf16.msra.mxu0 %v2676_v39  ;;  %v301_v39 = vmax.f32 %v290_v37, 0.0  ;;  %v580_v4 = vadd.f32 %v3319_v11, %v3318_v7  ;;  %v3347_v11 = vld [vmem:[#allocation53_spill] sm:$0xff] }
 0x1fe   :  { %1336 = vmatprep.subr.bf16.mxu0 %v2679_v40  ;;  %v303_v40 = vmax.f32 %v294_v38, 0.0  ;;  %v3321_v38 = vld [vmem:[#allocation16_spill] sm:$0xff] }
 0x1ff   :  { %1043 = vmatprep.mubr.bf16.mxu0 %v808_v63 }
 0x200   :  { %1044 = vmatmul.mubr.bf16.gmra.mxu0 %v807_v59 }
 0x201   :  { %1337 = vmatpush1.bf16.msra.mxu0 %v2689_v42  ;;  %1364 = vmatprep.mubr.bf16.mxu0 %v3288_v56  ;;  %v1331_v42 = vpack.c.bf16 %v303_v40, %v301_v39  ;;  %v3322_v39 = vld [vmem:[#allocation17_spill] sm:$0xff] }
 0x202   :  { %1338 = vmatprep.subr.bf16.mxu0 %v2691_v43  ;;  %v2358_v43 = vld [vmem:[#allocation8 + $0xa4] ss:$8 sps:$4 sm:$0xff]  }
 0x203   :  { %1295 = vmatprep.subr.bf16.mxu1 %v2358_v43 }
 0x205   :  { %1339 = vmatpush1.bf16.msra.mxu0 %v2695_v44  ;;  %v2356_v44 = vld [vmem:[#allocation8 + $0xa0] ss:$8 sps:$4 sm:$0xff]  }
 0x206   :  { %1340 = vmatprep.subr.bf16.mxu0 %v2697_v45  ;;  %1296 = vmatpush2.bf16.msra.mxu1 %v2356_v44  ;;  %v2361_v45 = vld [vmem:[#allocation8 + $0x94] ss:$8 sps:$4 sm:$0xff]  }
 0x207   :  { %1297 = vmatprep.subr.bf16.mxu1 %v2361_v45 }
 0x209   :  { %1341 = vmatpush1.bf16.msra.mxu0 %v2703_v46  ;;  %v2359_v46 = vld [vmem:[#allocation8 + $0x90] ss:$8 sps:$4 sm:$0xff]  }
 0x20a   :  { %1342 = vmatprep.subr.bf16.mxu0 %v2705_v47  ;;  %1298 = vmatpush2.bf16.msra.mxu1 %v2359_v46  ;;  %v2364_v47 = vld [vmem:[#allocation8 + $0x84] ss:$8 sps:$4 sm:$0xff]  }
 0x20b   :  { %1299 = vmatprep.subr.bf16.mxu1 %v2364_v47 }
 0x20d   :  { %1343 = vmatpush1.bf16.msra.mxu0 %v2709_v48  ;;  %v2362_v48 = vld [vmem:[#allocation8 + $0x80] ss:$8 sps:$4 sm:$0xff]  }
 0x20e   :  { %1344 = vmatprep.subr.bf16.mxu0 %v2714_v49  ;;  %1300 = vmatpush2.bf16.msra.mxu1 %v2362_v48  ;;  %v3307_v49 = vld [vmem:[#allocation58_spill] sm:$0xff] }
 0x20f   :  { %1397 = vmatprep.subr.bf16.mxu1 %v2726_v6 }
 0x211   :  { %1345 = vmatpush1.bf16.msra.mxu0 %v2716_v50  ;;  %v3308_v50 = vld [vmem:[#allocation59_spill] sm:$0xff] }
 0x212   :  { %1346 = vmatprep.subr.bf16.mxu0 %v2720_v51  ;;  %v3309_v51 = vld [vmem:[#allocation60_spill] sm:$0xff] }
 0x215   :  { %1347 = vmatpush1.bf16.msra.mxu0 %v2722_v52  ;;  %v3010_v52 = vpop.f32.mrf.mxu0 }
 0x216   :  { %1462 = vmatprep.subr.bf16.mxu0 %v2868_v1  ;;  %v3317_v1 = vld [vmem:[#allocation61_spill] sm:$0xff] }
 0x217   :  { %v3012_v13 = vpop.f32.mrf.mxu0 }
 0x218   :  { %1365 = vmatmul.mubr.bf16.vlgmr.msra.gmra.mxu0 %v2825_v33  ;;  %v3314_v33 = vld [vmem:[#allocation47_spill] sm:$0xff] }
 0x219   :  { %1374 = vmatprep.mubr.bf16.mxu0 %v3288_v56  ;;  %1463 = vmatpush1.bf16.msra.mxu0 %v2866_v62  ;;  %v3014_v15 = vpop.f32.mrf.mxu0 }
 0x21a   :  { %1464 = vmatprep.subr.bf16.mxu0 %v2870_v3 }
 0x21b   :  { %v3016_v16 = vpop.f32.mrf.mxu0 }
 0x21d   :  { %1465 = vmatpush1.bf16.msra.mxu0 %v2874_v60  ;;  %v3018_v6 = vpop.f32.mrf.mxu0 }
 0x21e   :  { %1466 = vmatprep.subr.bf16.mxu0 %v2877_v58 }
 0x21f   :  { %v3020_v17 = vpop.f32.mrf.mxu0 }
 0x220   :  { %1375 = vmatmul.mubr.bf16.gmra.mxu0 %v1331_v42 }
 0x221   :  { %1467 = vmatpush1.bf16.msra.mxu0 %v2880_v31 }
 0x222   :  { %1468 = vmatprep.subr.bf16.mxu0 %v2883_v35 }
 0x225   :  { %1469 = vmatpush1.bf16.msra.mxu0 %v2886_v61 }
 0x226   :  { %1470 = vmatprep.subr.bf16.mxu0 %v2889_v54  ;;  %v3316_v54 = vld [vmem:[#allocation50_spill] sm:$0xff] }
 0x229   :  { %1471 = vmatpush1.bf16.msra.mxu0 %v2892_v32 }
 0x22a   :  { %1472 = vmatprep.subr.bf16.mxu0 %v2895_v30 }
 0x22d   :  { %1473 = vmatpush1.bf16.msra.mxu0 %v2898_v29 }
 0x22e   :  { %1474 = vmatprep.subr.bf16.mxu0 %v2901_v28 }
 0x231   :  { %1475 = vmatpush1.bf16.msra.mxu0 %v2904_v27  ;;  %v3313_v27 = vld [vmem:[#allocation48_spill] sm:$0xff] }
 0x232   :  { %1476 = vmatprep.subr.bf16.mxu0 %v2907_v26 }
 0x235   :  { %1477 = vmatpush1.bf16.msra.mxu0 %v2910_v25 }
 0x236   :  { %1478 = vmatprep.subr.bf16.mxu0 %v2913_v24  ;;  %v3312_v24 = vld [vmem:[#allocation46_spill] sm:$0xff] }
 0x239   :  { %1479 = vmatpush2.bf16.msra.mxu0 %v2916_v23 }
 0x23a   :  { %1480 = vmatprep.subr.bf16.mxu0 %v2919_v22 }
 0x23d   :  { %1481 = vmatpush2.bf16.msra.mxu0 %v2922_v21 }
 0x23e   :  { %1482 = vmatprep.subr.bf16.mxu0 %v2925_v20  ;;  %v3311_v20 = vld [vmem:[#allocation44_spill] sm:$0xff] }
 0x241   :  { %1483 = vmatpush2.bf16.msra.mxu0 %v2928_v19  ;;  %v3310_v19 = vld [vmem:[#allocation42_spill] sm:$0xff] }
 0x242   :  { %1484 = vmatprep.subr.bf16.mxu0 %v2931_v18  ;;  %v3022_v18 = vpop.f32.mrf.mxu0  ;;  %v340_v21 = vrot.slane %v3311_v20, %v3310_v19 }
 0x244   :  { %v3026_v22 = vpop.f32.mrf.mxu0  ;;  %v564_v25 = vadd.f32 %v3312_v24, %v340_v21  ;;  %v568_v28 = vadd.f32 %v3313_v27, %v340_v21  ;;  %v574_v58 = vadd.f32 %v3316_v54, %v340_v21  ;;  %v578_v3 = vadd.f32 %v3317_v1, %v340_v21  ;;  %v3332_v27 = vld [vmem:[#allocation27_spill] sm:$0xff]  ;;  %v3339_v54 = vld [vmem:[#allocation34_spill] sm:$0xff] }
 0x245   :  { %1485 = vmatpush2.bf16.msra.mxu0 %v3307_v49  ;;  %v3327_v49 = vld [vmem:[#allocation22_spill] sm:$0xff] }
 0x246   :  { %1486 = vmatprep.subr.bf16.mxu0 %v3308_v50  ;;  %v3328_v50 = vld [vmem:[#allocation23_spill] sm:$0xff]  ;;  %v3343_v1 = vld [vmem:[#allocation38_spill] sm:$0xff] }
 0x249   :  { %1487 = vmatpush2.bf16.msra.mxu0 %v3309_v51  ;;  %v3329_v51 = vld [vmem:[#allocation24_spill] sm:$0xff] }
 0x24a   :  { %1488 = vmatprep.subr.bf16.mxu0 %v2358_v43 }
 0x24d   :  { %1489 = vmatpush2.bf16.msra.mxu0 %v2356_v44 }
 0x24e   :  { %1490 = vmatprep.subr.bf16.mxu0 %v2361_v45  ;;  %v3323_v45 = vld [vmem:[#allocation18_spill] sm:$0xff] }
 0x251   :  { %1491 = vmatpush2.bf16.msra.mxu0 %v2359_v46  ;;  %v3324_v46 = vld [vmem:[#allocation19_spill] sm:$0xff] }
 0x252   :  { %1492 = vmatprep.subr.bf16.mxu0 %v2364_v47  ;;  %v3325_v47 = vld [vmem:[#allocation20_spill] sm:$0xff] }
 0x255   :  { %1493 = vmatpush2.bf16.msra.mxu0 %v2362_v48  ;;  %v3326_v48 = vld [vmem:[#allocation21_spill] sm:$0xff] }
 0x2b8   :  { %v1035_v23 = vpop.f32.mrf.mxu0 }
 0x2b9   :  { %v1036_v29 = vadd.f32 %v1035_v23, %v564_v25  ;;  %v3330_v23 = vld [vmem:[#allocation25_spill] sm:$0xff]  ;;  %v3331_v25 = vld [vmem:[#allocation26_spill] sm:$0xff] }
 0x2ba   :  { %v1037_v26 = vpop.f32.mrf.mxu0 }
 0x2bb   :  { %v1038_v34 = vadd.f32 %v1037_v26, %v3314_v33  ;;  %v1054_v36 = vmax.f32 %v1036_v29, 0.0  ;;  %v3333_v33 = vld [vmem:[#allocation28_spill] sm:$0xff] }
 0x2bc   :  { %v1039_v30 = vpop.f32.mrf.mxu0 }
 0x2bd   :  { %v1040_v41 = vadd.f32 %v1039_v30, %v568_v28  ;;  %v1055_v60 = vmax.f32 %v1038_v34, 0.0  ;;  %v3334_v34 = vld [vmem:[#allocation29_spill] sm:$0xff] }
 0x2be   :  { %v1041_v55 = vpop.f32.mrf.mxu0 }
 0x2bf   :  { %v1056_v56 = vmax.f32 %v1040_v41, 0.0  ;;  %v1042_v5 = vadd.f32 %v1041_v55, %v3315_v2  ;;  %v3336_v2 = vld [vmem:[#allocation31_spill] sm:$0xff] }
 0x2c0   :  { %v1045_v32 = vpop.f32.mrf.mxu0 }
 0x2c1   :  { %v1062_v61 = vpack.c.bf16 %v1056_v56, %v1054_v36  ;;  %v1057_v31 = vmax.f32 %v1042_v5, 0.0  ;;  %v1046_v12 = vadd.f32 %v1045_v32, %v574_v58  ;;  %v3335_v56 = vld [vmem:[#allocation30_spill] sm:$0xff]  ;;  %v3337_v5 = vld [vmem:[#allocation32_spill] sm:$0xff]  ;;  %v3338_v32 = vld [vmem:[#allocation33_spill] sm:$0xff] }
 0x2c2   :  { %v1047_v62 = vpop.f32.mrf.mxu0  ;;  %v3340_v58 = vld [vmem:[#allocation35_spill] sm:$0xff] }
 0x2c3   :  { %v1063_v35 = vpack.c.bf16 %v1057_v31, %v1055_v60  ;;  %v1048_v53 = vadd.f32 %v1047_v62, %v3320_v57  ;;  %v1058_v63 = vmax.f32 %v1046_v12, 0.0  ;;  %v3342_v31 = vld [vmem:[#allocation37_spill] sm:$0xff]  ;;  %v3345_v12 = vld [vmem:[#allocation40_spill] sm:$0xff]  ;;  %v3348_v57 = vld [vmem:[#allocation54_spill] sm:$0xff] }
 0x2c4   :  { %v1049_v8 = vpop.f32.mrf.mxu0 }
 0x2c5   :  { %v1050_v14 = vadd.f32 %v1049_v8, %v578_v3  ;;  %1301 = vmatprep.mubr.bf16.mxu1 %v1063_v35  ;;  %v1059_v40 = vmax.f32 %v1048_v53, 0.0  ;;  %v3344_v3 = vld [vmem:[#allocation39_spill] sm:$0xff]  ;;  %v3346_v8 = vld [vmem:[#allocation52_spill] sm:$0xff] }
 0x2c6   :  { %v1051_v59 = vpop.f32.mrf.mxu0  ;;  %1302 = vmatmul.mubr.bf16.vlgmr.msra.gmra.mxu1 %v1062_v61  ;;  %v3341_v61 = vld [vmem:[#allocation36_spill] sm:$0xff] }
 0x2c7   :  { %v1060_v0 = vmax.f32 %v1050_v14, 0.0  ;;  %v1052_v37 = vadd.f32 %v1051_v59, %v580_v4  ;;  %1398 = vmatpush1.bf16.msra.mxu1 %v3321_v38 }
 0x2c8   :  { %1399 = vmatprep.subr.bf16.mxu1 %v3322_v39 }
 0x2c9   :  { %v1064_v42 = vpack.c.bf16 %v1060_v0, %v1058_v63  ;;  %v1061_v43 = vmax.f32 %v1052_v37, 0.0  ;;  %v3349_v63 = vld [vmem:[#allocation55_spill] sm:$0xff]  ;;  %v3350_v37 = vld [vmem:[#allocation56_spill] sm:$0xff] }
 0x2cb   :  { %v1065_v44 = vpack.c.bf16 %v1061_v43, %v1059_v40  ;;  %1400 = vmatpush1.bf16.msra.mxu1 %v3323_v45 }
 0x2cc   :  { %1401 = vmatprep.subr.bf16.mxu1 %v3324_v46 }
 0x2cd   :  { %1311 = vmatprep.mubr.bf16.mxu1 %v1065_v44 }
 0x2ce   :  { %1312 = vmatmul.mubr.bf16.gmra.mxu1 %v1064_v42  ;;  %v3351_v42 = vld [vmem:[#allocation57_spill] sm:$0xff] }
 0x2cf   :  { %1402 = vmatpush1.bf16.msra.mxu1 %v3325_v47 }
 0x2d0   :  { %1403 = vmatprep.subr.bf16.mxu1 %v3326_v48 }
 0x2d3   :  { %1404 = vmatpush1.bf16.msra.mxu1 %v3327_v49  ;;  %v3076_v49 = vld [vmem:[#allocation10 + $0x3] ss:$8 sm:$0x3] }
 0x2d4   :  { %1405 = vmatprep.subr.bf16.mxu1 %v3328_v50  ;;  %v3352_v50 = vld [vmem:[#allocation43_spill] sm:$0xff] }
 0x2d7   :  { %1406 = vmatpush1.bf16.msra.mxu1 %v3329_v51  ;;  %v3080_v51 = vrot.slane %v3076_v49, %v3352_v50  ;;  %v2373_v50 = vld [vmem:[%s3210_s6 + $0x20] sm:$0xff]  }
 0x2d8   :  { %v1366_v21 = vpop.f32.mrf.mxu0  ;;  %1407 = vmatprep.subr.bf16.mxu1 %v3330_v23 }
 0x2d9   :  { %v1367_v14 = vadd.f32 %v1366_v21, %v2952_v9 }
 0x2da   :  { %v1368_v24 = vpop.f32.mrf.mxu0 }
 0x2db   :  { %1408 = vmatpush1.bf16.msra.mxu1 %v3331_v25  ;;  %v1369_v28 = vadd.f32 %v1368_v24, %v2949_v10  ;;  %v1385_v39 = vmax.f32 %v1367_v14, 0.0 }
 0x2dc   :  { %v1370_v26 = vpop.f32.mrf.mxu0  ;;  %1409 = vmatprep.subr.bf16.mxu1 %v3332_v27 }
 0x2dd   :  { %v1386_v41 = vmax.f32 %v1369_v28, 0.0  ;;  %v1371_v4 = vadd.f32 %v1370_v26, %v2952_v9 }
 0x2de   :  { %v1372_v29 = vpop.f32.mrf.mxu0 }
 0x2df   :  { %v1373_v30 = vadd.f32 %v1372_v29, %v2949_v10  ;;  %1410 = vmatpush1.bf16.msra.mxu1 %v3333_v33  ;;  %v1387_v0 = vmax.f32 %v1371_v4, 0.0 }
 0x2e0   :  { %1411 = vmatprep.subr.bf16.mxu1 %v3334_v34  ;;  %v1376_v60 = vpop.f32.mrf.mxu0 }
 0x2e1   :  { %v1388_v55 = vmax.f32 %v1373_v30, 0.0  ;;  %v1393_v43 = vpack.c.bf16 %v1387_v0, %v1385_v39  ;;  %v1377_v46 = vadd.f32 %v1376_v60, %v2952_v9 }
 0x2e2   :  { %v1378_v62 = vpop.f32.mrf.mxu0 }
 0x2e3   :  { %v1394_v36 = vpack.c.bf16 %v1388_v55, %v1386_v41  ;;  %1412 = vmatpush1.bf16.msra.mxu1 %v3335_v56  ;;  %v1379_v59 = vadd.f32 %v1378_v62, %v2949_v10  ;;  %v3353_v41 = vld [vmem:[#allocation41_spill] sm:$0xff] }
 0x2e4   :  { %1413 = vmatprep.subr.bf16.mxu1 %v3336_v2  ;;  %v1380_v35 = vpop.f32.mrf.mxu0  ;;  %v347_v55 = vsub.s32 2, %v3353_v41 }
 0x2e5   :  { %1429 = vmatprep.mubr.bf16.mxu1 %v1394_v36  ;;  %v1390_v40 = vmax.f32 %v1379_v59, 0.0  ;;  %v1381_v44 = vadd.f32 %v1380_v35, %v2952_v9  ;;  %v351_v36 = vsub.s32 3, %v3353_v41 }
 0x2e6   :  { %v1382_v7 = vpop.f32.mrf.mxu0  ;;  %v348_v56 = vrot.slane %v3311_v20, %v347_v55 }
 0x2e7   :  { %1414 = vmatpush2.bf16.msra.mxu1 %v3337_v5  ;;  %v1383_v53 = vadd.f32 %v1382_v7, %v2949_v10  ;;  %v1391_v47 = vmax.f32 %v1381_v44, 0.0  ;;  %v1389_v10 = vmax.f32 %v1377_v46, 0.0  ;;  %v352_v2 = vrot.slane %v3311_v20, %v351_v36  ;;  %v2369_v46 = vld [vmem:[%s3210_s6 + $0x30] sm:$0xff]  }
 0x2e8   :  { %1415 = vmatprep.subr.bf16.mxu1 %v3338_v32  ;;  %v617_v32 = vadd.f32 %v3010_v52, %v348_v56  ;;  %v621_v60 = vadd.f32 %v3014_v15, %v348_v56  ;;  %v627_v20 = vadd.f32 %v3018_v6, %v348_v56  ;;  %v631_v15 = vadd.f32 %v3022_v18, %v348_v56  ;;  %v2366_v18 = vld [vmem:[%s3211_s7 + $0x30] sm:$0xff]  }
 0x2e9   :  { %v1392_v38 = vmax.f32 %v1383_v53, 0.0  ;;  %v1395_v48 = vpack.c.bf16 %v1391_v47, %v1389_v10  ;;  %v623_v62 = vadd.f32 %v3016_v16, %v352_v2  ;;  %v2368_v47 = vld [vmem:[%s3211_s7 + $0x28] sm:$0xff]  }
 0x2ea   :  { %v2371_v10 = vld [vmem:[%s3210_s6 + $0x28] sm:$0xff]  }
 0x2eb   :  { %1416 = vmatpush2.bf16.msra.mxu1 %v3339_v54  ;;  %v1396_v45 = vpack.c.bf16 %v1392_v38, %v1390_v40 }
 0x2ec   :  { %1417 = vmatprep.subr.bf16.mxu1 %v3340_v58  ;;  %v619_v58 = vadd.f32 %v3012_v13, %v352_v2  ;;  %v629_v13 = vadd.f32 %v3020_v17, %v352_v2  ;;  %v2365_v17 = vld [vmem:[%s3211_s7 + $0x38] sm:$0xff]  }
 0x2ef   :  { %1418 = vmatpush2.bf16.msra.mxu1 %v3341_v61 }
 0x2f0   :  { %1419 = vmatprep.subr.bf16.mxu1 %v3342_v31 }
 0x2f3   :  { %1420 = vmatpush2.bf16.msra.mxu1 %v3343_v1 }
 0x2f4   :  { %1421 = vmatprep.subr.bf16.mxu1 %v3344_v3 }
 0x2f7   :  { %1422 = vmatpush2.bf16.msra.mxu1 %v3345_v12 }
 0x2f8   :  { %1423 = vmatprep.subr.bf16.mxu1 %v3346_v8 }
 0x2fb   :  { %1424 = vmatpush2.bf16.msra.mxu1 %v3347_v11 }
 0x2fc   :  { %1425 = vmatprep.subr.bf16.mxu1 %v3348_v57 }
 0x2ff   :  { %1426 = vmatpush2.bf16.msra.mxu1 %v3349_v63  ;;  %v633_v63 = vadd.f32 %v3026_v22, %v352_v2  ;;  %v2367_v22 = vld [vmem:[%s3210_s6 + $0x38] sm:$0xff]   ;;  %v2376_v2 = vld [vmem:[%s3211_s7 + $0x8] sm:$0xff]  }
 0x300   :  { %1427 = vmatprep.subr.bf16.mxu1 %v3350_v37  ;;  %2115 = vmatprep.subr.bf16.mxu0 %v2367_v22 }
 0x303   :  { %1428 = vmatpush2.bf16.msra.mxu1 %v3351_v42 }
 0x304   :  { %2095 = vmatprep.subr.bf16.mxu1 %v2365_v17 }
 0x306   :  { %1430 = vmatmul.mubr.bf16.vlgmr.msra.gmra.mxu1 %v1393_v43 }
 0x307   :  { %1439 = vmatprep.mubr.bf16.mxu1 %v1396_v45  ;;  %2096 = vmatpush3.bf16.msra.mxu1 %v2365_v17 }
 0x308   :  { %2097 = vmatprep.subr.bf16.mxu1 %v2366_v18 }
 0x30b   :  { %2098 = vmatpush3.bf16.msra.mxu1 %v2366_v18 }
 0x30c   :  { %2099 = vmatprep.subr.bf16.mxu1 %v2368_v47 }
 0x30e   :  { %1440 = vmatmul.mubr.bf16.gmra.mxu1 %v1395_v48  ;;  %v2370_v48 = vld [vmem:[%s3211_s7 + $0x20] sm:$0xff]  }
 0x30f   :  { %2100 = vmatpush3.bf16.msra.mxu1 %v2368_v47 }
 0x310   :  { %2101 = vmatprep.subr.bf16.mxu1 %v2370_v48 }
 0x313   :  { %2102 = vmatpush3.bf16.msra.mxu1 %v2370_v48 }
 0x386   :  { %v3082_v21 = vpop.f32.mrf.mxu1 }
 0x388   :  { %v1305_v23 = vpop.f32.mrf.mxu1 }
 0x389   :  { %v3085_v24 = vadd.f32 %v1305_v23, %v3080_v51  ;;  %v2372_v23 = vld [vmem:[%s3211_s7 + $0x18] sm:$0xff]  }
 0x38a   :  { %v3087_v25 = vpop.f32.mrf.mxu1  ;;  %2103 = vmatprep.subr.bf16.mxu1 %v2372_v23 }
 0x38b   :  { %2104 = vmatpush3.bf16.msra.mxu1 %v2372_v23 }
 0x38c   :  { %v1309_v9 = vpop.f32.mrf.mxu1 }
 0x38d   :  { %v3090_v26 = vadd.f32 %v1309_v9, %v3080_v51  ;;  %v2375_v9 = vld [vmem:[%s3210_s6 + $0x18] sm:$0xff]  }
 0x38e   :  { %v3092_v27 = vpop.f32.mrf.mxu1 }
 0x390   :  { %v1315_v28 = vpop.f32.mrf.mxu1 }
 0x391   :  { %v3095_v29 = vadd.f32 %v1315_v28, %v3080_v51  ;;  %v2374_v28 = vld [vmem:[%s3211_s7 + $0x10] sm:$0xff]  }
 0x392   :  { %v3097_v30 = vpop.f32.mrf.mxu1  ;;  %2105 = vmatprep.subr.bf16.mxu1 %v2374_v28 }
 0x393   :  { %2106 = vmatpush3.bf16.msra.mxu1 %v2374_v28 }
 0x394   :  { %v1319_v33 = vpop.f32.mrf.mxu1  ;;  %2107 = vmatprep.subr.bf16.mxu1 %v2376_v2 }
 0x395   :  { %v3100_v34 = vadd.f32 %v1319_v33, %v3080_v51  ;;  %v1102_v33 = vrot.slane %v3076_v49, %v3310_v19  ;;  %v2377_v19 = vld [vmem:[%s3210_s6 + $0x10] sm:$0xff]  }
 0x397   :  { %v1304_v55 = vadd.f32 %v3082_v21, %v1102_v33  ;;  %v1323_v21 = vmax.f32 %v3085_v24, 0.0  ;;  %2108 = vmatpush3.bf16.msra.mxu1 %v2376_v2  ;;  %v1329_v18 = vmax.f32 %v3100_v34, 0.0 }
 0x399   :  { %v1322_v49 = vmax.f32 %v1304_v55, 0.0 }
 0x3c6   :  { %v1431_v5 = vpop.f32.mrf.mxu1 }
 0x3c7   :  { %v1432_v61 = vadd.f32 %v1431_v5, %v617_v32 }
 0x3c8   :  { %v1433_v54 = vpop.f32.mrf.mxu1 }
 0x3c9   :  { %v1434_v1 = vadd.f32 %v1433_v54, %v619_v58  ;;  %v1450_v12 = vmax.f32 %v1432_v61, 0.0  ;;  %v1308_v54 = vadd.f32 %v3087_v25, %v1102_v33  ;;  %v2379_v25 = vld [vmem:[%s3210_s6 + $0x8] sm:$0xff]  }
 0x3ca   :  { %v1435_v31 = vpop.f32.mrf.mxu1 }
 0x3cb   :  { %v1436_v3 = vadd.f32 %v1435_v31, %v621_v60  ;;  %v1451_v4 = vmax.f32 %v1434_v1, 0.0  ;;  %v1324_v24 = vmax.f32 %v1308_v54, 0.0  ;;  %v2385_v54 = vld [vmem:[%s3212_s8 + $0x8] sm:$0xff]  }
 0x3cc   :  { %v1437_v35 = vpop.f32.mrf.mxu1 }
 0x3cd   :  { %v1452_v8 = vmax.f32 %v1436_v3, 0.0  ;;  %v1438_v7 = vadd.f32 %v1437_v35, %v623_v62  ;;  %v2378_v62 = vld [vmem:[%s3211_s7] sm:$0xff]  }
 0x3ce   :  { %v1441_v11 = vpop.f32.mrf.mxu1  ;;  %2109 = vmatprep.subr.bf16.mxu1 %v2378_v62 }
 0x3cf   :  { %v1458_v52 = vpack.c.bf16 %v1452_v8, %v1450_v12  ;;  %v1453_v57 = vmax.f32 %v1438_v7, 0.0  ;;  %v1442_v59 = vadd.f32 %v1441_v11, %v627_v20  ;;  %v1314_v8 = vadd.f32 %v3092_v27, %v1102_v33  ;;  %2110 = vmatpush3.bf16.msra.mxu1 %v2378_v62 }
 0x3d0   :  { %v1443_v53 = vpop.f32.mrf.mxu1  ;;  %v1325_v11 = vmax.f32 %v3090_v26, 0.0 }
 0x3d1   :  { %v1459_v14 = vpack.c.bf16 %v1453_v57, %v1451_v4  ;;  %v1444_v0 = vadd.f32 %v1443_v53, %v629_v13  ;;  %v1454_v39 = vmax.f32 %v1442_v59, 0.0  ;;  %v2380_v57 = vld [vmem:[%s3204_s0 + $0x8] ss:$12 sps:$4 sm:$0xff]   ;;  %v2381_v13 = vld [vmem:[%s3204_s0 + $0x20] ss:$12 sps:$4 sm:$0xff]   ;;  %v1326_v26 = vmax.f32 %v1314_v8, 0.0 }
 0x3d2   :  { %v1445_v16 = vpop.f32.mrf.mxu1  ;;  %2111 = vmatprep.mubr.bf16.mxu1 %v2380_v57  ;;  %s2525_s0 = smov 64  }
 0x3d3   :  { %v1446_v37 = vadd.f32 %v1445_v16, %v631_v15  ;;  %1494 = vmatprep.mubr.bf16.mxu0 %v1459_v14  ;;  %v1455_v42 = vmax.f32 %v1444_v0, 0.0  ;;  %v1327_v16 = vmax.f32 %v3095_v29, 0.0  ;;  %2112 = vmatmul.mubr.bf16.vlgmr.msra.gmra.mxu1 %v2381_v13  ;;  %v2382_v0 = vld [vmem:[%s3210_s6] sm:$0xff]  }
 0x3d4   :  { %v1447_v38 = vpop.f32.mrf.mxu1  ;;  %1495 = vmatmul.mubr.bf16.vlgmr.msra.gmra.mxu0 %v1458_v52 }
 0x3d5   :  { %v1456_v6 = vmax.f32 %v1446_v37, 0.0  ;;  %v1448_v40 = vadd.f32 %v1447_v38, %v633_v63  ;;  %2116 = vmatpush3.bf16.msra.mxu0 %v2367_v22  ;;  %v1318_v37 = vadd.f32 %v3097_v30, %v1102_v33 }
 0x3d6   :  { %2117 = vmatprep.subr.bf16.mxu0 %v2369_v46 }
 0x3d7   :  { %v1460_v43 = vpack.c.bf16 %v1456_v6, %v1454_v39  ;;  %v1457_v44 = vmax.f32 %v1448_v40, 0.0  ;;  %v1328_v29 = vmax.f32 %v1318_v37, 0.0 }
 0x3d9   :  { %v1461_v45 = vpack.c.bf16 %v1457_v44, %v1455_v42  ;;  %2118 = vmatpush3.bf16.msra.mxu0 %v2369_v46 }
 0x3da   :  { %2119 = vmatprep.subr.bf16.mxu0 %v2371_v10 }
 0x3db   :  { %1504 = vmatprep.mubr.bf16.mxu0 %v1461_v45 }
 0x3dc   :  { %1505 = vmatmul.mubr.bf16.gmra.mxu0 %v1460_v43 }
 0x3dd   :  { %2120 = vmatpush3.bf16.msra.mxu0 %v2371_v10 }
 0x3de   :  { %2121 = vmatprep.subr.bf16.mxu0 %v2373_v50 }
 0x3e1   :  { %2122 = vmatpush3.bf16.msra.mxu0 %v2373_v50 }
 0x3e2   :  { %2123 = vmatprep.subr.bf16.mxu0 %v2375_v9 }
 0x3e5   :  { %2124 = vmatpush3.bf16.msra.mxu0 %v2375_v9 }
 0x3e6   :  { %2125 = vmatprep.subr.bf16.mxu0 %v2377_v19 }
 0x3e9   :  { %2126 = vmatpush3.bf16.msra.mxu0 %v2377_v19 }
 0x3ea   :  { %2127 = vmatprep.subr.bf16.mxu0 %v2379_v25 }
 0x3ed   :  { %2128 = vmatpush3.bf16.msra.mxu0 %v2379_v25 }
 0x3ee   :  { %2129 = vmatprep.subr.bf16.mxu0 %v2382_v0 }
 0x3f1   :  { %2130 = vmatpush3.bf16.msra.mxu0 %v2382_v0 }
 0x493   :  { %v2113_v19 = vpop.f32.mrf.mxu1 }
 0x494   :  { %v1496_v41 = vpop.f32.mrf.mxu0 }
 0x495   :  { %v1497_v36 = vadd.f32 %v1496_v41, %v1102_v33 }
 0x496   :  { %v1498_v56 = vpop.f32.mrf.mxu0 }
 0x497   :  { %v1515_v5 = vmax.f32 %v1497_v36, 0.0  ;;  %v1499_v32 = vadd.f32 %v1498_v56, %v3080_v51 }
 0x498   :  { %v1500_v58 = vpop.f32.mrf.mxu0 }
 0x499   :  { %v1516_v60 = vmax.f32 %v1499_v32, 0.0  ;;  %v1501_v61 = vadd.f32 %v1500_v58, %v1102_v33  ;;  %v1523_v1 = vmax.f32 %v1322_v49, %v1515_v5  ;;  %v2383_v5 = vld [vmem:[%s3212_s8 + $0x18] sm:$0xff]   ;;  %v2384_v32 = vld [vmem:[%s3212_s8 + $0x10] sm:$0xff]   ;;  %v2386_v58 = vld [vmem:[%s3212_s8] sm:$0xff]   ;;  %v1675_v49 = vpop.f32.mrf.mxu1  ;;  %s2526_s8 = smov [#allocation11]  }
 0x49a   :  { %v1502_v31 = vpop.f32.mrf.mxu0  ;;  %2135 = vmatprep.subr.bf16.mxu1 %v2383_v5  ;;  %s1899_s1 = sshll.u32 %s2526_s8, 4  ;;  %s1900_s1 = int_to_ptr.vmem [resolvable:$true] %s1899_s1 }
 0x49b   :  { %v1524_v3 = vmax.f32 %v1323_v21, %v1516_v60  ;;  %v1517_v35 = vmax.f32 %v1501_v61, 0.0  ;;  %v1503_v12 = vadd.f32 %v1502_v31, %v3080_v51  ;;  %2136 = vmatpush3.bf16.msra.mxu1 %v2383_v5  ;;  %v2114_v60 = vpop.f32.mrf.mxu1  ;;  %s2487_s29 = scalar_lea.vmem %s1900_s1, 512  ;;  %p2492_p12 = scmp.lt.s32.totalorder %s1900_s1, %s1900_s1 }
 0x49c   :  { %v1506_v7 = vpop.f32.mrf.mxu0  ;;  %2137 = vmatprep.subr.bf16.mxu1 %v2384_v32  ;;  %p2488_p11 = scmp.ne.s32.totalorder %s1900_s1, %s2487_s29  ;;  %p2493_p13 = scmp.lt.s32.totalorder %s2487_s29, %s2487_s29 }
 0x49d   :  { %v1518_v20 = vmax.f32 %v1503_v12, 0.0  ;;  %v1507_v4 = vadd.f32 %v1506_v7, %v1102_v33  ;;  %v1531_v52 = vmax.f32 %v1523_v1, %v1524_v3  ;;  %v1525_v15 = vmax.f32 %v1324_v24, %v1517_v35  ;;  %v122_v1 = vld [vmem:[#allocation10 + $0x4] ss:$0 sm:$0xff]  ;;  %v1678_v35 = vpop.f32.mrf.mxu1 }
 0x49e   :  { %v1508_v53 = vpop.f32.mrf.mxu0  ;;  %p2494_p0 = por %p2493_p13, %p2492_p12 }
 0x49f   :  { %v1526_v27 = vmax.f32 %v1325_v11, %v1518_v20  ;;  %v1519_v14 = vmax.f32 %v1507_v4, 0.0  ;;  %v1509_v59 = vadd.f32 %v1508_v53, %v3080_v51  ;;  %2138 = vmatpush3.bf16.msra.mxu1 %v2384_v32 }
 0x4a0   :  { %v1510_v63 = vpop.f32.mrf.mxu0  ;;  %2139 = vmatprep.subr.bf16.mxu1 %v2385_v54  ;;  %p2495_p1 = pnand %p2494_p0, %p2488_p11 }
 0x4a1   :  { %v1520_v38 = vmax.f32 %v1509_v59, 0.0  ;;  %v1511_v39 = vadd.f32 %v1510_v63, %v1102_v33  ;;  %v1532_v6 = vmax.f32 %v1525_v15, %v1526_v27  ;;  %v1527_v40 = vmax.f32 %v1326_v26, %v1519_v14  ;;  %v123_v27 = vld [vmem:[#allocation10 + $0x5] ss:$0 sm:$0xff] }
 0x4a2   :  { %v1512_v42 = vpop.f32.mrf.mxu0 }
 0x4a3   :  { %v1528_v43 = vmax.f32 %v1327_v16, %v1520_v38  ;;  %v1521_v44 = vmax.f32 %v1511_v39, 0.0  ;;  %v1513_v45 = vadd.f32 %v1512_v42, %v3080_v51  ;;  %v2159_v17 = vpack.i.bf16 %v1532_v6, %v1531_v52  ;;  %2140 = vmatpush3.bf16.msra.mxu1 %v2385_v54 }
 0x4a4   :  { %2141 = vmatprep.subr.bf16.mxu1 %v2386_v58 }
 0x4a5   :  { %v1533_v22 = vmax.f32 %v1527_v40, %v1528_v43  ;;  %v1522_v46 = vmax.f32 %v1513_v45, 0.0  ;;  %2160 = vrot.lane.b32.xlu0 %v2159_v17, %s2525_s0  ;;  %v1529_v30 = vmax.f32 %v1328_v29, %v1521_v44 }
 0x4a7   :  { %v1530_v47 = vmax.f32 %v1329_v18, %v1522_v46  ;;  %2142 = vmatpush3.bf16.msra.mxu1 %v2386_v58 }
 0x4a9   :  { %v1534_v10 = vmax.f32 %v1529_v30, %v1530_v47 }
 0x4ab   :  { %v2164_v48 = vpack.i.bf16 %v1534_v10, %v1533_v22 }
 0x4ad   :  { %2165 = vrot.lane.b32.xlu0 %v2164_v48, %s2525_s0 }
 0x517   :  { %v2161_v50 = vpop.permute.xlu0 %2160 }
 0x518   :  { %v2163_v23 = vunpack.i.h.bf16 %v2161_v50  ;;  %v2162_v9 = vunpack.i.l.bf16 %v2161_v50 }
 0x51a   :  { %v1544_v28 = vmax.f32 %v1532_v6, %v2163_v23  ;;  %v1543_v33 = vmax.f32 %v1531_v52, %v2162_v9 }
 0x51c   :  { %v1547_v51 = vpack.c.bf16 %v1544_v28, %v1543_v33 }
 0x51e   :  { %2131 = vmatprep.mubr.bf16.mxu0 %v1547_v51 }
 0x51f   :  { %v2166_v41 = vpop.permute.xlu0 %2165 }
 0x520   :  { %v2168_v55 = vunpack.i.h.bf16 %v2166_v41  ;;  %v2167_v36 = vunpack.i.l.bf16 %v2166_v41 }
 0x522   :  { %v1546_v34 = vmax.f32 %v1534_v10, %v2168_v55  ;;  %v1545_v56 = vmax.f32 %v1533_v22, %v2167_v36 }
 0x524   :  { %v1548_v2 = vpack.c.bf16 %v1546_v34, %v1545_v56 }
 0x526   :  { %2132 = vmatmul.mubr.bf16.vlgmr.msra.gmra.mxu0 %v1548_v2 }
 0x5e6   :  { %v2133_v21 = vpop.f32.mrf.mxu0 }
 0x5e7   :  { %v1781_v62 = vadd.f32 %v2133_v21, %v2113_v19 }
 0x5e8   :  { %v1772_v61 = vpop.f32.mrf.mxu0 }
 0x5e9   :  { %v1773_v31 = vadd.f32 %v1772_v61, %v1675_v49  ;;  %v1789_v11 = vadd.f32 %v1781_v62, %v122_v1 }
 0x5ea   :  { %v2134_v25 = vpop.f32.mrf.mxu0 }
 0x5eb   :  { %v1784_v3 = vadd.f32 %v2134_v25, %v2114_v60  ;;  %v1787_v24 = vadd.f32 %v1773_v31, %v122_v1  ;;  %v1793_v53 = vmax.f32 %v1789_v11, 0.0 }
 0x5ec   :  { %v1775_v12 = vpop.f32.mrf.mxu0 }
 0x5ed   :  { %v1790_v8 = vadd.f32 %v1784_v3, %v122_v1  ;;  %v1776_v7 = vadd.f32 %v1775_v12, %v1678_v35  ;;  %v1791_v52 = vmax.f32 %v1787_v24, 0.0 }
 0x5ef   :  { %v1788_v20 = vadd.f32 %v1776_v7, %v122_v1  ;;  %v1794_v4 = vmax.f32 %v1790_v8, 0.0 }
 0x5f1   :  { %v1792_v57 = vmax.f32 %v1788_v20, 0.0  ;;  %v1796_v15 = vpack.c.bf16 %v1794_v4, %v1793_v53 }
 0x5f3   :  { %v1795_v13 = vpack.c.bf16 %v1792_v57, %v1791_v52 }
 0x5f5   :  { %2143 = vmatprep.mubr.msk.bf16.mxu1 %vm1829_vm0, %v1795_v13 }
 0x5f6   :  { %2144 = vmatmul.mubr.msk.bf16.vlgmr.msra.gmra.mxu1 %vm1829_vm0, %v1796_v15 }
 0x6b6   :  { %v2145_v14 = vpop.f32.mrf.mxu1 }
 0x6b7   :  { %v1879_v59 = vadd.f32 %v2145_v14, %v123_v27 }
 0x6b8   :  { %v1870_v26 = vpop.f32.mrf.mxu1 }
 0x6b9   :  { %v1887_v16 = vmax.f32 %v1879_v59, 0.0  ;;  %v1871_v63 = vadd.f32 %v1870_v26, %v123_v27 }
 0x6ba   :  { %v2146_v0 = vpop.f32.mrf.mxu1 }
 0x6bb   :  { %1892 = vst.msk [vmem:[#allocation11 + $0x10] sm:$0xff] %vm1889_vm1, %v1887_v16  ;;  %v1885_v37 = vmax.f32 %v1871_v63, 0.0  ;;  %v1882_v38 = vadd.f32 %v2146_v0, %v123_v27 }
 0x6bc   :  { %v1873_v39 = vpop.f32.mrf.mxu1 }
 0x6bd   :  { %1890 = vst.msk [vmem:[#allocation11] sm:$0xff] %vm1889_vm1, %v1885_v37  ;;  %v1888_v6 = vmax.f32 %v1882_v38, 0.0  ;;  %v1874_v40 = vadd.f32 %v1873_v39, %v123_v27 }
 0x6bf   :  { %1893 = vst.msk [vmem:[#allocation11 + $0x18] sm:$0xff] %vm1889_vm1, %v1888_v6  ;;  %v1886_v42 = vmax.f32 %v1874_v40, 0.0 }
 0x6c1   :  { %1891 = vst.msk [vmem:[#allocation11 + $0x8] sm:$0xff] %vm1889_vm1, %v1886_v42 }
 0x6c2   :  { %2498 = shalt.err (!%p2495_p1)
}
 0x6c3   :  { %1905 = dma.vmem_to_hbm [thread:$0]  %s1900_s1, 512, %s3214_s10, [#allocation4], %s2517_s18, %s2517_s18, %s2518_s19  }
 0x6c4   :  { %2513 = dma.done.wait [#allocation4], 512  }
 0x6c5   :  { %2514 = vsyncadd [#allocation4], 4294966784 }
 0x6c6   :  { %1909 = vsyncpa [#allocation3], 1 }
 0x6c7   :  { %1910 = vsyncpa [#allocation6], 1 }
 0x6c8   :  { %1911 = vsyncpa [#allocation9], 1 }
 0x6c9   :  { %1912 = vsyncpa [#allocation4], 1 }

</bundles_post_ra>
